<compile_context>
chip_gen: v6e
topology: v6e:2x2x1
jax: 0.10.0
libtpu: 0.0.40
codegen_flags: <defaults>
</compile_context>

<pallas_src>
import jax
import jax.numpy as jnp
from jax.experimental import pallas as pl
from jax.experimental.pallas import tpu as pltpu


def conv1x1_kernel(w_ref, x_ref, b_ref, o_ref):
    # w_ref: (Cout, Cin)   -- VMEM-resident across all grid steps (constant index_map)
    # x_ref: (Cin, T)      -- streamed activation tile (T pixels, T % 128 == 0)
    # b_ref: (Cout, 1)     -- VMEM-resident
    # o_ref: (Cout, T)     -- lane-dense output tile
    acc = jnp.dot(w_ref[...], x_ref[...], preferred_element_type=jnp.float32)
    o_ref[...] = (acc + b_ref[...]).astype(o_ref.dtype)


def _round_up(x, m):
    return ((x + m - 1) // m) * m


def _conv1x1_reference(x_nchw, weight, bias):
    Cout, Cin = weight.shape[0], weight.shape[1]
    return (
        jnp.einsum("nchw,oc->nohw", x_nchw, weight.reshape(Cout, Cin))
        + bias.reshape(1, Cout, 1, 1)
    )


def conv2d_1x1(x_nchw, weight, bias, *, tile_hw=2048):
    """1x1 conv, stride 1, no padding.

    x_nchw: (N, Cin, H, W)
    weight: (Cout, Cin, 1, 1)
    bias:   (Cout,)
    returns (N, Cout, H, W)
    """
    N, Cin, H, W = x_nchw.shape
    Cout = weight.shape[0]
    HW = H * W
    itemsize = jnp.dtype(x_nchw.dtype).itemsize

    # ---- tiny-problem fast path: a kernel launch is pure overhead here ------
    out_bytes = N * Cout * HW * itemsize
    if HW < 128 or out_bytes < (1 << 20):
        return _conv1x1_reference(x_nchw, weight, bias)

    # ---- Pallas path ---------------------------------------------------------
    # NCHW -> (N, Cin, H*W): contiguous reshape, no transpose.
    x3 = x_nchw.reshape(N, Cin, HW)
    w_mat = weight.reshape(Cout, Cin)
    b_mat = bias.reshape(Cout, 1)

    # Lane-dense pixel tile: always a multiple of 128; Pallas clips the padded
    # tail (safe: the contraction dim Cin is always full, clipped columns are
    # discarded).
    hw_pad = _round_up(HW, 128)
    t = min(_round_up(tile_hw, 128), hw_pad)
    # Keep >= 2 grid steps when N == 1 so v7x's two TensorCores both get work.
    if N == 1 and t >= hw_pad and hw_pad > 128:
        t = _round_up(pl.cdiv(HW, 2), 128)
    grid_hw = pl.cdiv(HW, t)

    # VMEM budget: exact double-buffered working set (with sublane/lane padding
    # of the small resident operands) x 1.5 headroom, capped at 48 MiB so we
    # never approach v7x's 64 MiB physical VMEM (Mosaic needs internal scratch).
    cin_sub = _round_up(Cin, 8)
    cout_sub = _round_up(Cout, 8)
    x_buf = cin_sub * t * itemsize
    o_buf = cout_sub * t * itemsize
    w_buf = cout_sub * _round_up(Cin, 128) * itemsize
    b_buf = cout_sub * 128 * itemsize
    working_set = 2 * (x_buf + o_buf) + 2 * (w_buf + b_buf)
    vmem_limit = int(min(48 * 1024 * 1024,
                         max(int(1.5 * working_set), 16 * 1024 * 1024)))

    cost = pl.CostEstimate(
        flops=2 * N * Cout * Cin * HW,
        transcendentals=0,
        bytes_accessed=itemsize * (N * Cin * HW + Cout * Cin + Cout + N * Cout * HW),
    )

    out3 = pl.pallas_call(
        conv1x1_kernel,
        out_shape=jax.ShapeDtypeStruct((N, Cout, HW), x_nchw.dtype),
        grid_spec=pltpu.PrefetchScalarGridSpec(
            num_scalar_prefetch=0,
            grid=(N, grid_hw),
            in_specs=[
                # weight: constant index_map -> stays VMEM-resident, no re-DMA per tile
                pl.BlockSpec((Cout, Cin), lambda n, h: (0, 0)),
                # activations: stream (Cin, t) tiles; batch dim squeezed out
                pl.BlockSpec((None, Cin, t), lambda n, h: (n, 0, h)),
                # bias: VMEM-resident
                pl.BlockSpec((Cout, 1), lambda n, h: (0, 0)),
            ],
            out_specs=pl.BlockSpec((None, Cout, t), lambda n, h: (n, 0, h)),
        ),
        compiler_params=pltpu.CompilerParams(
            dimension_semantics=("parallel", "parallel"),
            vmem_limit_bytes=vmem_limit,
        ),
        cost_estimate=cost,
    )(w_mat, x3, b_mat)

    # (N, Cout, H*W) -> (N, Cout, H, W): contiguous reshape, no transpose.
    return out3.reshape(N, Cout, H, W)


if __name__ == "__main__":
    key = jax.random.PRNGKey(0)
    k_x, k_w, k_b, k_x2 = jax.random.split(key, 4)

    Cin, Cout = 28, 672
    # deterministic synthetic params (Conv2d(28, 672, kernel_size=1) shapes)
    weight = jax.random.normal(k_w, (Cout, Cin, 1, 1), dtype=jnp.float32) * 0.05
    bias = jax.random.normal(k_b, (Cout,), dtype=jnp.float32) * 0.05

    # 1) the module's actual forward shape (1, 28, 1, 1) -> tiny-problem fast path
    x_tiny = jax.random.normal(k_x, (1, Cin, 1, 1), dtype=jnp.float32)
    out_tiny = jax.block_until_ready(conv2d_1x1(x_tiny, weight, bias))
    ref_tiny = _conv1x1_reference(x_tiny, weight, bias)
    assert out_tiny.shape == (1, Cout, 1, 1), out_tiny.shape
    assert jnp.allclose(out_tiny, ref_tiny, atol=1e-4, rtol=1e-4)

    # 2) a small-but-nontrivial spatial size that exercises the Pallas path
    #    (HW = 1024 >= 128, output > 1 MiB; N == 1 triggers the 2-tile split)
    x_big = jax.random.normal(k_x2, (1, Cin, 32, 32), dtype=jnp.float32)
    out_big = jax.block_until_ready(conv2d_1x1(x_big, weight, bias))
    ref_big = _conv1x1_reference(x_big, weight, bias)
    assert out_big.shape == (1, Cout, 32, 32), out_big.shape
    assert jnp.allclose(out_big, ref_big, atol=1e-4, rtol=1e-4)

    print("KERNEL_OK")
</pallas_src>

<mosaic_0001>
module attributes {stable_mosaic.version = 11 : i64} {
  func.func @conv1x1_kernel(%arg0: i32, %arg1: i32, %arg2: memref<672x28xf32, #tpu.memory_space<vmem>>, %arg3: memref<1x28x512xf32, #tpu.memory_space<vmem>>, %arg4: memref<672x1xf32, #tpu.memory_space<vmem>>, %arg5: memref<1x672x512xf32, #tpu.memory_space<vmem>>) attributes {dimension_semantics = [#tpu.dimension_semantics<parallel>, #tpu.dimension_semantics<parallel>], iteration_bounds = array<i64: 1, 2>, scalar_prefetch = 0 : i64, scratch_operands = 0 : i64, tpu.core_type = #tpu.core_type<tc>, window_params = [{pipeline_mode = #tpu.pipeline_mode<synchronous>, transform_indices = @transform_0, window_bounds = array<i64: 672, 28>}, {transform_indices = @transform_1, window_bounds = array<i64: 1, 28, 512>}, {pipeline_mode = #tpu.pipeline_mode<synchronous>, transform_indices = @transform_2, window_bounds = array<i64: 672, 1>}, {transform_indices = @transform_3, window_bounds = array<i64: 1, 672, 512>}]} {
    %c0 = arith.constant 0 : index
    %c0_0 = arith.constant 0 : index
    %0 = vector.load %arg2[%c0, %c0_0] : memref<672x28xf32, #tpu.memory_space<vmem>>, vector<672x28xf32>
    %c0_1 = arith.constant 0 : index
    %c0_2 = arith.constant 0 : index
    %c0_3 = arith.constant 0 : index
    %1 = vector.load %arg3[%c0_1, %c0_2, %c0_3] : memref<1x28x512xf32, #tpu.memory_space<vmem>>, vector<1x28x512xf32>
    %2 = vector.shape_cast %1 : vector<1x28x512xf32> to vector<28x512xf32>
    %cst = arith.constant dense<0.000000e+00> : vector<672x512xf32>
    %3 = tpu.matmul %0, %2, %cst {dimension_numbers = #tpu.dot_dimension_numbers<[1], [0], [0], [1], [0, 0, 1, 1], [], []>} : vector<672x28xf32>, vector<28x512xf32>, vector<672x512xf32> -> vector<672x512xf32>
    %c0_4 = arith.constant 0 : index
    %c0_5 = arith.constant 0 : index
    %4 = vector.load %arg4[%c0_4, %c0_5] : memref<672x1xf32, #tpu.memory_space<vmem>>, vector<672x1xf32>
    %5 = vector.broadcast %4 : vector<672x1xf32> to vector<672x512xf32>
    %6 = arith.addf %3, %5 : vector<672x512xf32>
    %c0_6 = arith.constant 0 : index
    %c0_7 = arith.constant 0 : index
    %c0_8 = arith.constant 0 : index
    %7 = vector.load %arg5[%c0_6, %c0_7, %c0_8] : memref<1x672x512xf32, #tpu.memory_space<vmem>>, vector<1x672x512xf32>
    %8 = vector.shape_cast %7 : vector<1x672x512xf32> to vector<672x512xf32>
    %9 = vector.shape_cast %6 : vector<672x512xf32> to vector<1x672x512xf32>
    tpu.vector_store %arg5[%c0_6, %c0_7, %c0_8], %9 {strides = array<i32>} : memref<1x672x512xf32, #tpu.memory_space<vmem>>, vector<1x672x512xf32>,
    return
  }
  func.func @transform_0(%arg0: i32, %arg1: i32) -> (i32, i32) {
    %c0_i32 = arith.constant 0 : i32
    %c0_i32_0 = arith.constant 0 : i32
    %c0_i32_1 = arith.constant 0 : i32
    return %c0_i32, %c0_i32_0 : i32, i32
  }
  func.func @transform_1(%arg0: i32, %arg1: i32) -> (i32, i32, i32) {
    %c0_i32 = arith.constant 0 : i32
    %c0_i32_0 = arith.constant 0 : i32
    return %arg0, %c0_i32, %arg1 : i32, i32, i32
  }
  func.func @transform_2(%arg0: i32, %arg1: i32) -> (i32, i32) {
    %c0_i32 = arith.constant 0 : i32
    %c0_i32_0 = arith.constant 0 : i32
    %c0_i32_1 = arith.constant 0 : i32
    return %c0_i32, %c0_i32_0 : i32, i32
  }
  func.func @transform_3(%arg0: i32, %arg1: i32) -> (i32, i32, i32) {
    %c0_i32 = arith.constant 0 : i32
    %c0_i32_0 = arith.constant 0 : i32
    return %arg0, %c0_i32, %arg1 : i32, i32, i32
  }
}

</mosaic_0001>

<bundles_post_ra>
// kernel: tpu_custom_call.1
= control target key start
LH: loop header
LB: loop body
LE: loop exit
PB: predicated region body
PF: predicated region fallthrough
CT: control target
= control target key end

     0   :  { %8 = vsyncpa [#allocation4], 0  ;;  %s4359_s0 = inlined_call_operand.vmem [shape: f32[672,28], index: 0, kind: input, shape index: {}]   ;;  %s4360_s1 = inlined_call_operand.vmem [shape: f32[1,28,1024], index: 1, kind: input, shape index: {}]   ;;  %s4361_s2 = inlined_call_operand.vmem [shape: f32[672,1], index: 2, kind: input, shape index: {}]   ;;  %s4362_s3 = inlined_call_operand.hbm [shape: f32[1,672,1024], index: 3, kind: output, shape index: {}]  }
   0x1   :  { %10 = vsyncpa [#allocation4 + $0x1], 0  ;;  %s3035_s12 = smov 0   ;;  %s3037_s13 = smov 0  }
   0x2   :  { %s3039_s14 = smov 0   ;;  %s3041_s15 = smov 0  }
   0x3   :  { %s3043_s16 = smov 0   ;;  %s3045_s17 = smov 0  }
   0x4 LB: > { %s2681_s18 = sadd.s32 4294967295, %s3007_s17   ;;  %s2682_s19 = sadd.s32 4294967294, %s3007_s17   ;;  %s3007_s17 = sphi %s3045_s17, %s16_s17   ;;  %s3003_s16 = sphi %s3043_s16, %s4369_s16   ;;  %s2999_s15 = sphi %s3041_s15, %s4368_s15   ;;  %s2995_s14 = sphi %s3039_s14, %s4367_s14   ;;  %s2991_s13 = sphi %s3037_s13, %s4366_s13   ;;  %s2987_s12 = sphi %s3035_s12, %s4365_s12  }
   0x5   : > { %s25_s20 = sadd.s32 1, %s3003_s16  ;;  %s58_s21 = sadd.s32 1, %s2995_s14 }
   0x6   : > { %p26_p0 = scmp.ge.s32.totalorder %s25_s20, 2  ;;  %p65_p1 = scmp.ne.s32.totalorder %s2995_s14, %s2991_s13 }
   0x7   : > { %p66_p2 = scmp.eq.s32.totalorder %s3007_s17, 0  ;;  %p118_p3 = scmp.eq.s32.totalorder %s2681_s18, 1 }
   0x8   : > { %s4371_s20 = smov (%p26_p0, %s25_s20), 0  ;;  %p123_p6 = scmp.ne.s32.totalorder %s2991_s13, %s2987_s12 }
   0x9   : > { %p67_p4 = por %p66_p2, %p65_p1  ;;  %p3074_p5 = por %p118_p3, %p65_p1 }
   0xa   : > { %s54_s23 = ssub.s32 %s3003_s16, %s4371_s20  ;;  %p124_p8 = scmp.eq.s32.totalorder %s2682_s19, 1 }
   0xb   : > { %p56_p7 = scmp.eq.s32.totalorder %s54_s23, 0  ;;  %p2684_p10 = scmp.ge.s32.totalorder %s3007_s17, 2 }
   0xc   : > { %p3085_p9 = por %p124_p8, %p123_p6 }
   0xd   : > { %s3083_s24 = scalar_select %p56_p7, %s2995_s14, %s58_s21  }
   0xe   : > { %146 = sbr.rel (%p2684_p10) target bundleno = 31 (0x1f), region = 24 }
  0x13   : > { %149 = sbr.rel (!%p67_p4) target bundleno = 31 (0x1f), region = 28  ;;  %s151_s26 = sand.u32 (%p67_p4), 1, %s2995_s14  }
  0x14   : > { %s2866_s27 = sshll.u32 (%p67_p4), %s3003_s16, 5  ;;  %s2685_s28 = sshll.u32 (%p67_p4), %s151_s26, 7 }
  0x15   : > { %s3097_s4 = scalar_lea.vmem (%p67_p4), %s4360_s1, %s2866_s27  ;;  %s153_s5 = scalar_lea.vmem (%p67_p4), [#allocation2], %s2685_s28 }
  0x16   : > { %v171_v0 = vld [vmem:[%s3097_s4] sm:$0xff] (%p67_p4)  ;;  %v173_v1 = vld [vmem:[%s3097_s4 + $0x8] sm:$0xff] (%p67_p4)  ;;  %v175_v2 = vld [vmem:[%s3097_s4 + $0x10] sm:$0xff] (%p67_p4) }
  0x17   : > { %172 = vst [vmem:[%s153_s5] sm:$0xff] (%p67_p4), %v171_v0  ;;  %174 = vst [vmem:[%s153_s5 + $0x8] sm:$0xff] (%p67_p4), %v173_v1  ;;  %v177_v3 = vld [vmem:[%s3097_s4 + $0x18] sm:$0xff] (%p67_p4)  ;;  %v179_v4 = vld [vmem:[%s3097_s4 + $0x40] sm:$0xff] (%p67_p4) }
  0x18   : > { %176 = vst [vmem:[%s153_s5 + $0x10] sm:$0xff] %v175_v2  ;;  %v181_v5 = vld [vmem:[%s3097_s4 + $0x48] sm:$0xff]  ;;  %178 = vst [vmem:[%s153_s5 + $0x18] sm:$0xff] %v177_v3  ;;  %v183_v6 = vld [vmem:[%s3097_s4 + $0x50] sm:$0xff] }
  0x19   : > { %180 = vst [vmem:[%s153_s5 + $0x20] sm:$0xff] %v179_v4  ;;  %182 = vst [vmem:[%s153_s5 + $0x28] sm:$0xff] %v181_v5  ;;  %v185_v7 = vld [vmem:[%s3097_s4 + $0x58] sm:$0xff]  ;;  %v187_v8 = vld [vmem:[%s3097_s4 + $0x80] sm:$0xff] }
  0x1a   : > { %184 = vst [vmem:[%s153_s5 + $0x30] sm:$0xff] %v183_v6  ;;  %186 = vst [vmem:[%s153_s5 + $0x38] sm:$0xff] %v185_v7  ;;  %v189_v9 = vld [vmem:[%s3097_s4 + $0x88] sm:$0xff]  ;;  %v191_v10 = vld [vmem:[%s3097_s4 + $0x90] sm:$0xff] }
  0x1b   : > { %188 = vst [vmem:[%s153_s5 + $0x40] sm:$0xff] %v187_v8  ;;  %v193_v11 = vld [vmem:[%s3097_s4 + $0x98] sm:$0xff]  ;;  %190 = vst [vmem:[%s153_s5 + $0x48] sm:$0xff] %v189_v9  ;;  %v195_v12 = vld [vmem:[%s3097_s4 + $0xc0] sm:$0xff] }
  0x1c   : > { %192 = vst [vmem:[%s153_s5 + $0x50] sm:$0xff] %v191_v10  ;;  %194 = vst [vmem:[%s153_s5 + $0x58] sm:$0xff] %v193_v11  ;;  %v197_v13 = vld [vmem:[%s3097_s4 + $0xc8] sm:$0xff]  ;;  %v199_v14 = vld [vmem:[%s3097_s4 + $0xd0] sm:$0xff] }
  0x1d   : > { %196 = vst [vmem:[%s153_s5 + $0x60] sm:$0xff] %v195_v12  ;;  %198 = vst [vmem:[%s153_s5 + $0x68] sm:$0xff] %v197_v13  ;;  %v201_v15 = vld [vmem:[%s3097_s4 + $0xd8] sm:$0xff] }
  0x1e   : > { %200 = vst [vmem:[%s153_s5 + $0x70] sm:$0xff] %v199_v14  ;;  %202 = vst [vmem:[%s153_s5 + $0x78] sm:$0xff] %v201_v15 }
  0x1f PF: > { %p2688_p11 = scmp.ge.s32.totalorder %s3007_s17, 1  ;;  %p207_p12 = scmp.lt.s32.totalorder %s3007_s17, 3 }
  0x21   : > { %p208_p13 = pnand %p2688_p11, %p207_p12 }
  0x22   : > { %s3118_s6 = sand.u32 (!%p208_p13), 1, %s2991_s13   ;;  %s2867_s23 = sshll.u32 (!%p208_p13), %s2999_s15, 9 }
  0x23   : > { %211 = sbr.rel (%p208_p13) target bundleno = 595 (0x253), region = 51  ;;  %s2689_s7 = sshll.u32 (!%p208_p13), %s3118_s6, 7 }
  0x24   : > { %s216_s8 = scalar_lea.vmem (!%p208_p13), [#allocation2], %s2689_s7  ;;  %s2868_s27 = smul.u32 (!%p208_p13), 2688, %s3118_s6 }
  0x25   : > { %s4305_s28 = scalar_lea.hbm (!%p208_p13), %s4362_s3, %s2867_s23  ;;  %s2584_s29 = scalar_lea.sflag (!%p208_p13), [#allocation4], %s3118_s6 }
  0x26   : > { %s3726_s5 = scalar_lea.vmem (!%p208_p13), [#allocation3], %s2868_s27  ;;  %s3011_s4 = smov (!%p208_p13), [#allocation3]  }
  0x27   : > { %s2599_s26 = sshll.u32 (!%p208_p13), %s3726_s5, 4  ;;  %s2935_s7 = sshll.u32 (!%p208_p13), %s3011_s4, 4  ;;  %s4307_s26 = int_to_ptr.vmem [resolvable:$true] %s2599_s26  ;;  %s2936_s7 = int_to_ptr.vmem [resolvable:$false] %s2935_s7 }
  0x28   : > { %vm1096_vm0 = vcmask 1043456   ;;  %v3009_v16 = vmov 0.0   ;;  %v3010_v17 = vmov 0   ;;  %v336_v18 = vld [vmem:[%s216_s8 + $0x68] sm:$0xf]  ;;  %v334_v23 = vld [vmem:[%s216_s8 + $0x58] sm:$0xff]  ;;  %p2938_p3 = scmp.lt.s32.totalorder %s4307_s26, %s2936_s7 }
  0x29   : > { %1173 = vmatprep.mubr.f32.mxu0 %v3009_v16  ;;  %1742 = vmatprep.mubr.f32.mxu1 %v3009_v16  ;;  %v338_v19 = vld [vmem:[%s216_s8 + $0x78] sm:$0xf]  ;;  %v332_v20 = vld [vmem:[%s216_s8 + $0x48] sm:$0xff]  ;;  %v335_v21 = vld [vmem:[%s216_s8 + $0x60] sm:$0xf]  ;;  %vm843_vm1 = vcmask 228352  }
  0x2a   : > { %2929 = vset.pattern.permute.xlu0 %v3010_v17  ;;  %2930 = vset.pattern.permute.xlu1 %v3010_v17  ;;  %v337_v22 = vld [vmem:[%s216_s8 + $0x70] sm:$0xf]  ;;  %v331_v24 = vld [vmem:[%s216_s8 + $0x40] sm:$0xff]  ;;  %v328_v26 = vld [vmem:[%s216_s8 + $0x28] sm:$0xff]  ;;  %s2931_s30 = scalar_lea.vmem %s4307_s26, 43008 }
  0x2b   : > { %2690 = vmatprep.subr.msk.mxu0 %vm1096_vm0, %v336_v18  ;;  %2776 = vmatprep.subr.msk.mxu1 %vm1096_vm0, %v338_v19  ;;  %v333_v25 = vld [vmem:[%s216_s8 + $0x50] sm:$0xff]  ;;  %v330_v27 = vld [vmem:[%s216_s8 + $0x38] sm:$0xff]  ;;  %v327_v28 = vld [vmem:[%s216_s8 + $0x20] sm:$0xff]  ;;  %p2932_p0 = scmp.ne.s32.totalorder %s4307_s26, %s2931_s30 }
  0x2c   : > { %2691 = vmatpush1.msk.msra.mxu0 %vm1096_vm0, %v335_v21  ;;  %2777 = vmatpush1.msk.msra.mxu1 %vm1096_vm0, %v337_v22  ;;  %v329_v29 = vld [vmem:[%s216_s8 + $0x30] sm:$0xff]  ;;  %v324_v30 = vld [vmem:[%s216_s8 + $0x8] sm:$0xff]  ;;  %v326_v31 = vld [vmem:[%s216_s8 + $0x18] sm:$0xff] }
  0x2d   : > { %1135 = vmatprep.subr.mxu0 %v332_v20  ;;  %1704 = vmatprep.subr.mxu1 %v334_v23  ;;  %v323_v32 = vld [vmem:[%s216_s8] sm:$0xff]  ;;  %v325_v33 = vld [vmem:[%s216_s8 + $0x10] sm:$0xff]  ;;  %v240_v37 = vld [vmem:[%s4359_s0 + $0x8] sm:$0xff]  ;;  %p2933_p1 = pnand %p2932_p0, %p3074_p5  ;;  %s2937_s8 = scalar_lea.vmem %s2936_s7, 86016 }
  0x2e   : > { %1136 = vmatpush1.msra.mxu0 %v331_v24  ;;  %1705 = vmatpush1.msra.mxu1 %v333_v25  ;;  %v239_v34 = vld [vmem:[%s4359_s0] sm:$0xff]  ;;  %v341_v36 = vld [vmem:[%s4361_s2 + $0x10] sm:$0xff]  ;;  %v340_v38 = vld [vmem:[%s4361_s2 + $0x8] sm:$0xff]  ;;  %p2939_p4 = scmp.lt.s32.totalorder %s2937_s8, %s2931_s30 }
  0x2f   : > { %1137 = vmatprep.subr.mxu0 %v328_v26  ;;  %1706 = vmatprep.subr.mxu1 %v330_v27  ;;  %v339_v35 = vld [vmem:[%s4361_s2] sm:$0xff]  ;;  %v342_v39 = vld [vmem:[%s4361_s2 + $0x18] sm:$0xff]  ;;  %v241_v40 = vld [vmem:[%s4359_s0 + $0x10] sm:$0xff]  ;;  %p2934_p2 = pneg %p2933_p1 }
  0x30   : > { %1138 = vmatpush1.msra.mxu0 %v327_v28  ;;  %1707 = vmatpush1.msra.mxu1 %v329_v29  ;;  %v344_v41 = vld [vmem:[%s4361_s2 + $0x28] sm:$0xff]  ;;  %v343_v42 = vld [vmem:[%s4361_s2 + $0x20] sm:$0xff]  ;;  %v242_v43 = vld [vmem:[%s4359_s0 + $0x18] sm:$0xff]  ;;  %p2940_p6 = por %p2939_p4, %p2938_p3 }
  0x31   : > { %1139 = vmatprep.subr.mxu0 %v324_v30  ;;  %1708 = vmatprep.subr.mxu1 %v326_v31  ;;  %v346_v44 = vld [vmem:[%s4361_s2 + $0x38] sm:$0xff]  ;;  %v345_v45 = vld [vmem:[%s4361_s2 + $0x30] sm:$0xff]  ;;  %v243_v46 = vld [vmem:[%s4359_s0 + $0x20] sm:$0xff] }
  0x32   : > { %1140 = vmatpush1.msra.mxu0 %v323_v32  ;;  %1709 = vmatpush1.msra.mxu1 %v325_v33  ;;  %v348_v47 = vld [vmem:[%s4361_s2 + $0x48] sm:$0xff]  ;;  %v347_v48 = vld [vmem:[%s4361_s2 + $0x40] sm:$0xff]  ;;  %v350_v50 = vld [vmem:[%s4361_s2 + $0x58] sm:$0xff]  ;;  %p2941_p7 = pnand %p2940_p6, %p2934_p2 }
  0x33   : > { %2692 = vmatmul.mubr.msk.f32.vlgmr.msra.gmra.mxu0 %vm843_vm1, %v239_v34  ;;  %2778 = vmatmul.mubr.msk.f32.vlgmr.msra.gmra.mxu1 %vm843_vm1, %v239_v34  ;;  %v244_v49 = vld [vmem:[%s4359_s0 + $0x28] sm:$0xff]  ;;  %v349_v51 = vld [vmem:[%s4361_s2 + $0x50] sm:$0xff]  ;;  %v351_v54 = vld [vmem:[%s4361_s2 + $0x60] sm:$0xff] }
  0x34   : > { %1179 = vmatprep.mubr.f32.mxu0 %v3009_v16  ;;  %1748 = vmatprep.mubr.f32.mxu1 %v3009_v16  ;;  %v245_v52 = vld [vmem:[%s4359_s0 + $0x30] sm:$0xff]  ;;  %v352_v53 = vld [vmem:[%s4361_s2 + $0x68] sm:$0xff]  ;;  %v246_v55 = vld [vmem:[%s4359_s0 + $0x38] sm:$0xff] }
  0x35   : > { %425 = vperm.xlu0 %2929, %v339_v35   ;;  %435 = vperm.xlu1 %2930, %v341_v36   ;;  %v354_v56 = vld [vmem:[%s4361_s2 + $0x78] sm:$0xff]  ;;  %v353_v57 = vld [vmem:[%s4361_s2 + $0x70] sm:$0xff]  ;;  %v247_v58 = vld [vmem:[%s4359_s0 + $0x40] sm:$0xff] }
  0x36   : > { %v356_v59 = vld [vmem:[%s4361_s2 + $0x88] sm:$0xff]  ;;  %v355_v60 = vld [vmem:[%s4361_s2 + $0x80] sm:$0xff]  ;;  %v358_v62 = vld [vmem:[%s4361_s2 + $0x98] sm:$0xff] }
  0x37   : > { %2693 = vmatmul.mubr.msk.f32.gmra.mxu0 %vm843_vm1, %v240_v37  ;;  %2779 = vmatmul.mubr.msk.f32.gmra.mxu1 %vm843_vm1, %v240_v37  ;;  %v248_v61 = vld [vmem:[%s4359_s0 + $0x48] sm:$0xff]  ;;  %v357_v63 = vld [vmem:[%s4361_s2 + $0x90] sm:$0xff]  ;;  %v359_v2 = vld [vmem:[%s4361_s2 + $0xa0] sm:$0xff] }
  0x38   : > { %1185 = vmatprep.mubr.f32.mxu0 %v3009_v16  ;;  %1754 = vmatprep.mubr.f32.mxu1 %v3009_v16  ;;  %v249_v0 = vld [vmem:[%s4359_s0 + $0x50] sm:$0xff]  ;;  %v360_v1 = vld [vmem:[%s4361_s2 + $0xa8] sm:$0xff]  ;;  %v250_v3 = vld [vmem:[%s4359_s0 + $0x58] sm:$0xff] }
  0x39   : > { %430 = vperm.xlu0 %2929, %v340_v38   ;;  %440 = vperm.xlu1 %2930, %v342_v39   ;;  %v362_v4 = vld [vmem:[%s4361_s2 + $0xb8] sm:$0xff]  ;;  %v361_v5 = vld [vmem:[%s4361_s2 + $0xb0] sm:$0xff]  ;;  %v251_v6 = vld [vmem:[%s4359_s0 + $0x60] sm:$0xff] }
  0x3a   : > { %v364_v7 = vld [vmem:[%s4361_s2 + $0xc8] sm:$0xff]  ;;  %v363_v8 = vld [vmem:[%s4361_s2 + $0xc0] sm:$0xff]  ;;  %v366_v10 = vld [vmem:[%s4361_s2 + $0xd8] sm:$0xff] }
  0x3b   : > { %2694 = vmatmul.mubr.msk.f32.gmra.mxu0 %vm843_vm1, %v241_v40  ;;  %2780 = vmatmul.mubr.msk.f32.gmra.mxu1 %vm843_vm1, %v241_v40  ;;  %v252_v9 = vld [vmem:[%s4359_s0 + $0x68] sm:$0xff]  ;;  %v365_v11 = vld [vmem:[%s4361_s2 + $0xd0] sm:$0xff]  ;;  %v367_v14 = vld [vmem:[%s4361_s2 + $0xe0] sm:$0xff] }
  0x3c   : > { %1191 = vmatprep.mubr.f32.mxu0 %v3009_v16  ;;  %1760 = vmatprep.mubr.f32.mxu1 %v3009_v16  ;;  %v253_v12 = vld [vmem:[%s4359_s0 + $0x70] sm:$0xff]  ;;  %v368_v13 = vld [vmem:[%s4361_s2 + $0xe8] sm:$0xff]  ;;  %v254_v15 = vld [vmem:[%s4359_s0 + $0x78] sm:$0xff] }
  0x3d   : > { %450 = vperm.xlu1 %2930, %v344_v41   ;;  %445 = vperm.xlu0 %2929, %v343_v42   ;;  %v370_v17 = vld [vmem:[%s4361_s2 + $0xf8] sm:$0xff]  ;;  %v369_v18 = vld [vmem:[%s4361_s2 + $0xf0] sm:$0xff]  ;;  %v255_v19 = vld [vmem:[%s4359_s0 + $0x80] sm:$0xff] }
  0x3e   : > { %v372_v20 = vld [vmem:[%s4361_s2 + $0x108] sm:$0xff]  ;;  %v371_v21 = vld [vmem:[%s4361_s2 + $0x100] sm:$0xff]  ;;  %v374_v23 = vld [vmem:[%s4361_s2 + $0x118] sm:$0xff] }
  0x3f   : > { %2695 = vmatmul.mubr.msk.f32.gmra.mxu0 %vm843_vm1, %v242_v43  ;;  %2781 = vmatmul.mubr.msk.f32.gmra.mxu1 %vm843_vm1, %v242_v43  ;;  %v256_v22 = vld [vmem:[%s4359_s0 + $0x88] sm:$0xff]  ;;  %v373_v24 = vld [vmem:[%s4361_s2 + $0x110] sm:$0xff]  ;;  %v375_v27 = vld [vmem:[%s4361_s2 + $0x120] sm:$0xff] }
  0x40   : > { %1197 = vmatprep.mubr.f32.mxu0 %v3009_v16  ;;  %1766 = vmatprep.mubr.f32.mxu1 %v3009_v16  ;;  %v257_v25 = vld [vmem:[%s4359_s0 + $0x90] sm:$0xff]  ;;  %v376_v26 = vld [vmem:[%s4361_s2 + $0x128] sm:$0xff]  ;;  %v258_v28 = vld [vmem:[%s4359_s0 + $0x98] sm:$0xff] }
  0x41   : > { %460 = vperm.xlu1 %2930, %v346_v44   ;;  %455 = vperm.xlu0 %2929, %v345_v45   ;;  %v378_v29 = vld [vmem:[%s4361_s2 + $0x138] sm:$0xff]  ;;  %v377_v30 = vld [vmem:[%s4361_s2 + $0x130] sm:$0xff]  ;;  %v259_v31 = vld [vmem:[%s4359_s0 + $0xa0] sm:$0xff] }
  0x42   : > { %v380_v32 = vld [vmem:[%s4361_s2 + $0x148] sm:$0xff]  ;;  %v379_v33 = vld [vmem:[%s4361_s2 + $0x140] sm:$0xff]  ;;  %v382_v35 = vld [vmem:[%s4361_s2 + $0x158] sm:$0xff] }
  0x43   : > { %2696 = vmatmul.mubr.msk.f32.gmra.mxu0 %vm843_vm1, %v243_v46  ;;  %2782 = vmatmul.mubr.msk.f32.gmra.mxu1 %vm843_vm1, %v243_v46  ;;  %v260_v34 = vld [vmem:[%s4359_s0 + $0xa8] sm:$0xff]  ;;  %v381_v36 = vld [vmem:[%s4361_s2 + $0x150] sm:$0xff]  ;;  %v383_v39 = vld [vmem:[%s4361_s2 + $0x160] sm:$0xff] }
  0x44   : > { %1203 = vmatprep.mubr.f32.mxu0 %v3009_v16  ;;  %1772 = vmatprep.mubr.f32.mxu1 %v3009_v16  ;;  %v261_v37 = vld [vmem:[%s4359_s0 + $0xb0] sm:$0xff]  ;;  %v384_v38 = vld [vmem:[%s4361_s2 + $0x168] sm:$0xff]  ;;  %v262_v40 = vld [vmem:[%s4359_s0 + $0xb8] sm:$0xff] }
  0x45   : > { %470 = vperm.xlu1 %2930, %v348_v47   ;;  %465 = vperm.xlu0 %2929, %v347_v48   ;;  %v386_v41 = vld [vmem:[%s4361_s2 + $0x178] sm:$0xff]  ;;  %v385_v42 = vld [vmem:[%s4361_s2 + $0x170] sm:$0xff]  ;;  %v263_v43 = vld [vmem:[%s4359_s0 + $0xc0] sm:$0xff] }
  0x46   : > { %v388_v44 = vld [vmem:[%s4361_s2 + $0x188] sm:$0xff]  ;;  %v387_v45 = vld [vmem:[%s4361_s2 + $0x180] sm:$0xff]  ;;  %v390_v47 = vld [vmem:[%s4361_s2 + $0x198] sm:$0xff] }
  0x47   : > { %2697 = vmatmul.mubr.msk.f32.gmra.mxu0 %vm843_vm1, %v244_v49  ;;  %2783 = vmatmul.mubr.msk.f32.gmra.mxu1 %vm843_vm1, %v244_v49  ;;  %v264_v46 = vld [vmem:[%s4359_s0 + $0xc8] sm:$0xff]  ;;  %v389_v48 = vld [vmem:[%s4361_s2 + $0x190] sm:$0xff] }
  0x48   : > { %1209 = vmatprep.mubr.f32.mxu0 %v3009_v16  ;;  %1778 = vmatprep.mubr.f32.mxu1 %v3009_v16  ;;  %v265_v49 = vld [vmem:[%s4359_s0 + $0xd0] sm:$0xff] }
  0x49   : > { %480 = vperm.xlu1 %2930, %v350_v50   ;;  %475 = vperm.xlu0 %2929, %v349_v51   ;;  %v392_v50 = vld [vmem:[%s4361_s2 + $0x1a8] sm:$0xff]  ;;  %v391_v51 = vld [vmem:[%s4361_s2 + $0x1a0] sm:$0xff] }
  0x4b   : > { %2698 = vmatmul.mubr.msk.f32.gmra.mxu0 %vm843_vm1, %v245_v52  ;;  %2784 = vmatmul.mubr.msk.f32.gmra.mxu1 %vm843_vm1, %v245_v52  ;;  %v266_v52 = vld [vmem:[%s4359_s0 + $0xd8] sm:$0xff] }
  0x4c   : > { %1215 = vmatprep.mubr.f32.mxu0 %v3009_v16  ;;  %1784 = vmatprep.mubr.f32.mxu1 %v3009_v16 }
  0x4d   : > { %490 = vperm.xlu1 %2930, %v352_v53   ;;  %485 = vperm.xlu0 %2929, %v351_v54   ;;  %v394_v53 = vld [vmem:[%s4361_s2 + $0x1b8] sm:$0xff]  ;;  %v393_v54 = vld [vmem:[%s4361_s2 + $0x1b0] sm:$0xff] }
  0x4f   : > { %2699 = vmatmul.mubr.msk.f32.gmra.mxu0 %vm843_vm1, %v246_v55  ;;  %2785 = vmatmul.mubr.msk.f32.gmra.mxu1 %vm843_vm1, %v246_v55  ;;  %v267_v55 = vld [vmem:[%s4359_s0 + $0xe0] sm:$0xff] }
  0x50   : > { %1221 = vmatprep.mubr.f32.mxu0 %v3009_v16  ;;  %1790 = vmatprep.mubr.f32.mxu1 %v3009_v16 }
  0x51   : > { %500 = vperm.xlu1 %2930, %v354_v56   ;;  %495 = vperm.xlu0 %2929, %v353_v57   ;;  %v396_v56 = vld [vmem:[%s4361_s2 + $0x1c8] sm:$0xff]  ;;  %v395_v57 = vld [vmem:[%s4361_s2 + $0x1c0] sm:$0xff] }
  0x53   : > { %2700 = vmatmul.mubr.msk.f32.gmra.mxu0 %vm843_vm1, %v247_v58  ;;  %2786 = vmatmul.mubr.msk.f32.gmra.mxu1 %vm843_vm1, %v247_v58  ;;  %v268_v58 = vld [vmem:[%s4359_s0 + $0xe8] sm:$0xff] }
  0x54   : > { %1227 = vmatprep.mubr.f32.mxu0 %v3009_v16  ;;  %1796 = vmatprep.mubr.f32.mxu1 %v3009_v16 }
  0x55   : > { %510 = vperm.xlu1 %2930, %v356_v59   ;;  %505 = vperm.xlu0 %2929, %v355_v60   ;;  %v398_v59 = vld [vmem:[%s4361_s2 + $0x1d8] sm:$0xff]  ;;  %v397_v60 = vld [vmem:[%s4361_s2 + $0x1d0] sm:$0xff] }
  0x57   : > { %2701 = vmatmul.mubr.msk.f32.gmra.mxu0 %vm843_vm1, %v248_v61  ;;  %2787 = vmatmul.mubr.msk.f32.gmra.mxu1 %vm843_vm1, %v248_v61  ;;  %v269_v61 = vld [vmem:[%s4359_s0 + $0xf0] sm:$0xff] }
  0x58   : > { %1233 = vmatprep.mubr.f32.mxu0 %v3009_v16  ;;  %1802 = vmatprep.mubr.f32.mxu1 %v3009_v16 }
  0x59   : > { %520 = vperm.xlu1 %2930, %v358_v62   ;;  %515 = vperm.xlu0 %2929, %v357_v63   ;;  %v400_v62 = vld [vmem:[%s4361_s2 + $0x1e8] sm:$0xff]  ;;  %v399_v63 = vld [vmem:[%s4361_s2 + $0x1e0] sm:$0xff] }
  0x5b   : > { %2702 = vmatmul.mubr.msk.f32.gmra.mxu0 %vm843_vm1, %v249_v0  ;;  %2788 = vmatmul.mubr.msk.f32.gmra.mxu1 %vm843_vm1, %v249_v0  ;;  %v270_v0 = vld [vmem:[%s4359_s0 + $0xf8] sm:$0xff] }
  0x5c   : > { %1239 = vmatprep.mubr.f32.mxu0 %v3009_v16  ;;  %1808 = vmatprep.mubr.f32.mxu1 %v3009_v16 }
  0x5d   : > { %530 = vperm.xlu1 %2930, %v360_v1   ;;  %525 = vperm.xlu0 %2929, %v359_v2   ;;  %v402_v1 = vld [vmem:[%s4361_s2 + $0x1f8] sm:$0xff]  ;;  %v401_v2 = vld [vmem:[%s4361_s2 + $0x1f0] sm:$0xff] }
  0x5f   : > { %2703 = vmatmul.mubr.msk.f32.gmra.mxu0 %vm843_vm1, %v250_v3  ;;  %2789 = vmatmul.mubr.msk.f32.gmra.mxu1 %vm843_vm1, %v250_v3  ;;  %v271_v3 = vld [vmem:[%s4359_s0 + $0x100] sm:$0xff] }
  0x60   : > { %1245 = vmatprep.mubr.f32.mxu0 %v3009_v16  ;;  %1814 = vmatprep.mubr.f32.mxu1 %v3009_v16 }
  0x61   : > { %540 = vperm.xlu1 %2930, %v362_v4   ;;  %535 = vperm.xlu0 %2929, %v361_v5   ;;  %v404_v4 = vld [vmem:[%s4361_s2 + $0x208] sm:$0xff]  ;;  %v403_v5 = vld [vmem:[%s4361_s2 + $0x200] sm:$0xff] }
  0x63   : > { %2704 = vmatmul.mubr.msk.f32.gmra.mxu0 %vm843_vm1, %v251_v6  ;;  %2790 = vmatmul.mubr.msk.f32.gmra.mxu1 %vm843_vm1, %v251_v6  ;;  %v272_v6 = vld [vmem:[%s4359_s0 + $0x108] sm:$0xff] }
  0x64   : > { %1251 = vmatprep.mubr.f32.mxu0 %v3009_v16  ;;  %1820 = vmatprep.mubr.f32.mxu1 %v3009_v16 }
  0x65   : > { %550 = vperm.xlu1 %2930, %v364_v7   ;;  %545 = vperm.xlu0 %2929, %v363_v8   ;;  %v406_v7 = vld [vmem:[%s4361_s2 + $0x218] sm:$0xff]  ;;  %v405_v8 = vld [vmem:[%s4361_s2 + $0x210] sm:$0xff] }
  0x67   : > { %2705 = vmatmul.mubr.msk.f32.gmra.mxu0 %vm843_vm1, %v252_v9  ;;  %2791 = vmatmul.mubr.msk.f32.gmra.mxu1 %vm843_vm1, %v252_v9  ;;  %v273_v9 = vld [vmem:[%s4359_s0 + $0x110] sm:$0xff] }
  0x68   : > { %1257 = vmatprep.mubr.f32.mxu0 %v3009_v16  ;;  %1826 = vmatprep.mubr.f32.mxu1 %v3009_v16 }
  0x69   : > { %560 = vperm.xlu1 %2930, %v366_v10   ;;  %555 = vperm.xlu0 %2929, %v365_v11   ;;  %v408_v10 = vld [vmem:[%s4361_s2 + $0x228] sm:$0xff]  ;;  %v407_v11 = vld [vmem:[%s4361_s2 + $0x220] sm:$0xff] }
  0x6b   : > { %2706 = vmatmul.mubr.msk.f32.gmra.mxu0 %vm843_vm1, %v253_v12  ;;  %2792 = vmatmul.mubr.msk.f32.gmra.mxu1 %vm843_vm1, %v253_v12  ;;  %v274_v12 = vld [vmem:[%s4359_s0 + $0x118] sm:$0xff] }
  0x6c   : > { %1263 = vmatprep.mubr.f32.mxu0 %v3009_v16  ;;  %1832 = vmatprep.mubr.f32.mxu1 %v3009_v16 }
  0x6d   : > { %570 = vperm.xlu1 %2930, %v368_v13   ;;  %565 = vperm.xlu0 %2929, %v367_v14   ;;  %v410_v13 = vld [vmem:[%s4361_s2 + $0x238] sm:$0xff]  ;;  %v409_v14 = vld [vmem:[%s4361_s2 + $0x230] sm:$0xff] }
  0x6f   : > { %2707 = vmatmul.mubr.msk.f32.gmra.mxu0 %vm843_vm1, %v254_v15  ;;  %2793 = vmatmul.mubr.msk.f32.gmra.mxu1 %vm843_vm1, %v254_v15  ;;  %v275_v15 = vld [vmem:[%s4359_s0 + $0x120] sm:$0xff] }
  0x70   : > { %1269 = vmatprep.mubr.f32.mxu0 %v3009_v16  ;;  %1838 = vmatprep.mubr.f32.mxu1 %v3009_v16 }
  0x71   : > { %580 = vperm.xlu1 %2930, %v370_v17   ;;  %575 = vperm.xlu0 %2929, %v369_v18   ;;  %v412_v17 = vld [vmem:[%s4361_s2 + $0x248] sm:$0xff]  ;;  %v411_v18 = vld [vmem:[%s4361_s2 + $0x240] sm:$0xff] }
  0x73   : > { %2708 = vmatmul.mubr.msk.f32.gmra.mxu0 %vm843_vm1, %v255_v19  ;;  %2794 = vmatmul.mubr.msk.f32.gmra.mxu1 %vm843_vm1, %v255_v19  ;;  %v276_v19 = vld [vmem:[%s4359_s0 + $0x128] sm:$0xff] }
  0x74   : > { %1275 = vmatprep.mubr.f32.mxu0 %v3009_v16  ;;  %1844 = vmatprep.mubr.f32.mxu1 %v3009_v16 }
  0x75   : > { %590 = vperm.xlu1 %2930, %v372_v20   ;;  %585 = vperm.xlu0 %2929, %v371_v21   ;;  %v414_v20 = vld [vmem:[%s4361_s2 + $0x258] sm:$0xff]  ;;  %v413_v21 = vld [vmem:[%s4361_s2 + $0x250] sm:$0xff] }
  0x77   : > { %2709 = vmatmul.mubr.msk.f32.gmra.mxu0 %vm843_vm1, %v256_v22  ;;  %2795 = vmatmul.mubr.msk.f32.gmra.mxu1 %vm843_vm1, %v256_v22  ;;  %v277_v22 = vld [vmem:[%s4359_s0 + $0x130] sm:$0xff] }
  0x78   : > { %1281 = vmatprep.mubr.f32.mxu0 %v3009_v16  ;;  %1850 = vmatprep.mubr.f32.mxu1 %v3009_v16 }
  0x79   : > { %600 = vperm.xlu1 %2930, %v374_v23   ;;  %595 = vperm.xlu0 %2929, %v373_v24   ;;  %v416_v23 = vld [vmem:[%s4361_s2 + $0x268] sm:$0xff]  ;;  %v415_v24 = vld [vmem:[%s4361_s2 + $0x260] sm:$0xff] }
  0x7b   : > { %2710 = vmatmul.mubr.msk.f32.gmra.mxu0 %vm843_vm1, %v257_v25  ;;  %2796 = vmatmul.mubr.msk.f32.gmra.mxu1 %vm843_vm1, %v257_v25  ;;  %v278_v25 = vld [vmem:[%s4359_s0 + $0x138] sm:$0xff] }
  0x7c   : > { %1287 = vmatprep.mubr.f32.mxu0 %v3009_v16  ;;  %1856 = vmatprep.mubr.f32.mxu1 %v3009_v16 }
  0x7d   : > { %610 = vperm.xlu1 %2930, %v376_v26   ;;  %605 = vperm.xlu0 %2929, %v375_v27   ;;  %v418_v26 = vld [vmem:[%s4361_s2 + $0x278] sm:$0xff]  ;;  %v417_v27 = vld [vmem:[%s4361_s2 + $0x270] sm:$0xff] }
  0x7f   : > { %2711 = vmatmul.mubr.msk.f32.gmra.mxu0 %vm843_vm1, %v258_v28  ;;  %2797 = vmatmul.mubr.msk.f32.gmra.mxu1 %vm843_vm1, %v258_v28  ;;  %v279_v28 = vld [vmem:[%s4359_s0 + $0x140] sm:$0xff] }
  0x80   : > { %1293 = vmatprep.mubr.f32.mxu0 %v3009_v16  ;;  %1862 = vmatprep.mubr.f32.mxu1 %v3009_v16 }
  0x81   : > { %620 = vperm.xlu1 %2930, %v378_v29   ;;  %615 = vperm.xlu0 %2929, %v377_v30   ;;  %v420_v29 = vld [vmem:[%s4361_s2 + $0x288] sm:$0xff]  ;;  %v419_v30 = vld [vmem:[%s4361_s2 + $0x280] sm:$0xff] }
  0x83   : > { %2712 = vmatmul.mubr.msk.f32.gmra.mxu0 %vm843_vm1, %v259_v31  ;;  %2798 = vmatmul.mubr.msk.f32.gmra.mxu1 %vm843_vm1, %v259_v31  ;;  %v280_v31 = vld [vmem:[%s4359_s0 + $0x148] sm:$0xff] }
  0x84   : > { %1299 = vmatprep.mubr.f32.mxu0 %v3009_v16  ;;  %1868 = vmatprep.mubr.f32.mxu1 %v3009_v16 }
  0x85   : > { %630 = vperm.xlu1 %2930, %v380_v32   ;;  %625 = vperm.xlu0 %2929, %v379_v33   ;;  %v422_v32 = vld [vmem:[%s4361_s2 + $0x298] sm:$0xff]  ;;  %v421_v33 = vld [vmem:[%s4361_s2 + $0x290] sm:$0xff] }
  0x87   : > { %2713 = vmatmul.mubr.msk.f32.gmra.mxu0 %vm843_vm1, %v260_v34  ;;  %2799 = vmatmul.mubr.msk.f32.gmra.mxu1 %vm843_vm1, %v260_v34  ;;  %v281_v34 = vld [vmem:[%s4359_s0 + $0x150] sm:$0xff] }
  0x88   : > { %1305 = vmatprep.mubr.f32.mxu0 %v3009_v16  ;;  %1874 = vmatprep.mubr.f32.mxu1 %v3009_v16 }
  0x89   : > { %640 = vperm.xlu1 %2930, %v382_v35   ;;  %635 = vperm.xlu0 %2929, %v381_v36   ;;  %v282_v35 = vld [vmem:[%s4359_s0 + $0x158] sm:$0xff]  ;;  %v283_v36 = vld [vmem:[%s4359_s0 + $0x160] sm:$0xff] }
  0x8b   : > { %2714 = vmatmul.mubr.msk.f32.gmra.mxu0 %vm843_vm1, %v261_v37  ;;  %2800 = vmatmul.mubr.msk.f32.gmra.mxu1 %vm843_vm1, %v261_v37  ;;  %v284_v37 = vld [vmem:[%s4359_s0 + $0x168] sm:$0xff] }
  0x8c   : > { %1311 = vmatprep.mubr.f32.mxu0 %v3009_v16  ;;  %1880 = vmatprep.mubr.f32.mxu1 %v3009_v16 }
  0x8d   : > { %650 = vperm.xlu1 %2930, %v384_v38   ;;  %645 = vperm.xlu0 %2929, %v383_v39   ;;  %v285_v38 = vld [vmem:[%s4359_s0 + $0x170] sm:$0xff]  ;;  %v286_v39 = vld [vmem:[%s4359_s0 + $0x178] sm:$0xff] }
  0x8f   : > { %2715 = vmatmul.mubr.msk.f32.gmra.mxu0 %vm843_vm1, %v262_v40  ;;  %2801 = vmatmul.mubr.msk.f32.gmra.mxu1 %vm843_vm1, %v262_v40 }
  0x90   : > { %1317 = vmatprep.mubr.f32.mxu0 %v3009_v16  ;;  %1886 = vmatprep.mubr.f32.mxu1 %v3009_v16 }
  0x91   : > { %660 = vperm.xlu1 %2930, %v386_v41   ;;  %655 = vperm.xlu0 %2929, %v385_v42   ;;  %v287_v41 = vld [vmem:[%s4359_s0 + $0x180] sm:$0xff] }
  0x93   : > { %2716 = vmatmul.mubr.msk.f32.gmra.mxu0 %vm843_vm1, %v263_v43  ;;  %2802 = vmatmul.mubr.msk.f32.gmra.mxu1 %vm843_vm1, %v263_v43 }
  0x94   : > { %1323 = vmatprep.mubr.f32.mxu0 %v3009_v16  ;;  %1892 = vmatprep.mubr.f32.mxu1 %v3009_v16 }
  0x95   : > { %670 = vperm.xlu1 %2930, %v388_v44   ;;  %665 = vperm.xlu0 %2929, %v387_v45  }
  0x97   : > { %2717 = vmatmul.mubr.msk.f32.gmra.mxu0 %vm843_vm1, %v264_v46  ;;  %2803 = vmatmul.mubr.msk.f32.gmra.mxu1 %vm843_vm1, %v264_v46 }
  0x98   : > { %1329 = vmatprep.mubr.f32.mxu0 %v3009_v16  ;;  %1898 = vmatprep.mubr.f32.mxu1 %v3009_v16 }
  0x99   : > { %680 = vperm.xlu1 %2930, %v390_v47   ;;  %675 = vperm.xlu0 %2929, %v389_v48   ;;  %v288_v47 = vld [vmem:[%s4359_s0 + $0x188] sm:$0xff] }
  0x9b   : > { %2718 = vmatmul.mubr.msk.f32.gmra.mxu0 %vm843_vm1, %v265_v49  ;;  %2804 = vmatmul.mubr.msk.f32.gmra.mxu1 %vm843_vm1, %v265_v49 }
  0x9c   : > { %1335 = vmatprep.mubr.f32.mxu0 %v3009_v16  ;;  %1904 = vmatprep.mubr.f32.mxu1 %v3009_v16 }
  0x9d   : > { %690 = vperm.xlu1 %2930, %v392_v50   ;;  %685 = vperm.xlu0 %2929, %v391_v51  }
  0x9f   : > { %2719 = vmatmul.mubr.msk.f32.gmra.mxu0 %vm843_vm1, %v266_v52  ;;  %2805 = vmatmul.mubr.msk.f32.gmra.mxu1 %vm843_vm1, %v266_v52 }
  0xa0   : > { %1341 = vmatprep.mubr.f32.mxu0 %v3009_v16  ;;  %1910 = vmatprep.mubr.f32.mxu1 %v3009_v16 }
  0xa1   : > { %700 = vperm.xlu1 %2930, %v394_v53   ;;  %695 = vperm.xlu0 %2929, %v393_v54  }
  0xa3   : > { %2720 = vmatmul.mubr.msk.f32.gmra.mxu0 %vm843_vm1, %v267_v55  ;;  %2806 = vmatmul.mubr.msk.f32.gmra.mxu1 %vm843_vm1, %v267_v55 }
  0xa4   : > { %1347 = vmatprep.mubr.f32.mxu0 %v3009_v16  ;;  %1916 = vmatprep.mubr.f32.mxu1 %v3009_v16 }
  0xa5   : > { %710 = vperm.xlu1 %2930, %v396_v56   ;;  %705 = vperm.xlu0 %2929, %v395_v57   ;;  %v289_v57 = vld [vmem:[%s4359_s0 + $0x190] sm:$0xff] }
  0xa7   : > { %2721 = vmatmul.mubr.msk.f32.gmra.mxu0 %vm843_vm1, %v268_v58  ;;  %2807 = vmatmul.mubr.msk.f32.gmra.mxu1 %vm843_vm1, %v268_v58 }
  0xa8   : > { %1353 = vmatprep.mubr.f32.mxu0 %v3009_v16  ;;  %1922 = vmatprep.mubr.f32.mxu1 %v3009_v16 }
  0xa9   : > { %720 = vperm.xlu1 %2930, %v398_v59   ;;  %715 = vperm.xlu0 %2929, %v397_v60  }
  0xab   : > { %2722 = vmatmul.mubr.msk.f32.gmra.mxu0 %vm843_vm1, %v269_v61  ;;  %2808 = vmatmul.mubr.msk.f32.gmra.mxu1 %vm843_vm1, %v269_v61 }
  0xac   : > { %1359 = vmatprep.mubr.f32.mxu0 %v3009_v16  ;;  %1928 = vmatprep.mubr.f32.mxu1 %v3009_v16 }
  0xad   : > { %730 = vperm.xlu1 %2930, %v400_v62   ;;  %725 = vperm.xlu0 %2929, %v399_v63  }
  0xaf   : > { %2723 = vmatmul.mubr.msk.f32.gmra.mxu0 %vm843_vm1, %v270_v0  ;;  %2809 = vmatmul.mubr.msk.f32.gmra.mxu1 %vm843_vm1, %v270_v0 }
  0xb0   : > { %1365 = vmatprep.mubr.f32.mxu0 %v3009_v16  ;;  %1934 = vmatprep.mubr.f32.mxu1 %v3009_v16  ;;  %v426_v40 = vpop.permute.xlu0 %425  ;;  %v436_v56 = vpop.permute.xlu1 %435 }
  0xb1   : > { %740 = vperm.xlu1 %2930, %v402_v1   ;;  %735 = vperm.xlu0 %2929, %v401_v2   ;;  %v290_v2 = vld [vmem:[%s4359_s0 + $0x198] sm:$0xff] }
  0xb3   : > { %2724 = vmatmul.mubr.msk.f32.gmra.mxu0 %vm843_vm1, %v271_v3  ;;  %2810 = vmatmul.mubr.msk.f32.gmra.mxu1 %vm843_vm1, %v271_v3 }
  0xb4   : > { %1371 = vmatprep.mubr.f32.mxu0 %v3009_v16  ;;  %1940 = vmatprep.mubr.f32.mxu1 %v3009_v16  ;;  %v431_v46 = vpop.permute.xlu0 %430 }
  0xb5   : > { %750 = vperm.xlu1 %2930, %v404_v4   ;;  %745 = vperm.xlu0 %2929, %v403_v5   ;;  %v441_v5 = vpop.permute.xlu1 %440 }
  0xb7   : > { %2725 = vmatmul.mubr.msk.f32.gmra.mxu0 %vm843_vm1, %v272_v6  ;;  %2811 = vmatmul.mubr.msk.f32.gmra.mxu1 %vm843_vm1, %v272_v6 }
  0xb8   : > { %1377 = vmatprep.mubr.f32.mxu0 %v3009_v16  ;;  %1946 = vmatprep.mubr.f32.mxu1 %v3009_v16 }
  0xb9   : > { %760 = vperm.xlu1 %2930, %v406_v7   ;;  %755 = vperm.xlu0 %2929, %v405_v8  }
  0xbb   : > { %2726 = vmatmul.mubr.msk.f32.gmra.mxu0 %vm843_vm1, %v273_v9  ;;  %2812 = vmatmul.mubr.msk.f32.gmra.mxu1 %vm843_vm1, %v273_v9 }
  0xbc   : > { %1383 = vmatprep.mubr.f32.mxu0 %v3009_v16  ;;  %1952 = vmatprep.mubr.f32.mxu1 %v3009_v16 }
  0xbd   : > { %770 = vperm.xlu1 %2930, %v408_v10   ;;  %765 = vperm.xlu0 %2929, %v407_v11  }
  0xbf   : > { %2727 = vmatmul.mubr.msk.f32.gmra.mxu0 %vm843_vm1, %v274_v12  ;;  %2813 = vmatmul.mubr.msk.f32.gmra.mxu1 %vm843_vm1, %v274_v12  ;;  %v291_v12 = vld [vmem:[%s4359_s0 + $0x1a0] sm:$0xff] }
  0xc0   : > { %1389 = vmatprep.mubr.f32.mxu0 %v3009_v16  ;;  %1958 = vmatprep.mubr.f32.mxu1 %v3009_v16 }
  0xc1   : > { %780 = vperm.xlu1 %2930, %v410_v13   ;;  %775 = vperm.xlu0 %2929, %v409_v14  }
  0xc3   : > { %2728 = vmatmul.mubr.msk.f32.gmra.mxu0 %vm843_vm1, %v275_v15  ;;  %2814 = vmatmul.mubr.msk.f32.gmra.mxu1 %vm843_vm1, %v275_v15  ;;  %v446_v15 = vpop.permute.xlu0 %445 }
  0xc4   : > { %1395 = vmatprep.mubr.f32.mxu0 %v3009_v16  ;;  %1964 = vmatprep.mubr.f32.mxu1 %v3009_v16 }
  0xc5   : > { %790 = vperm.xlu1 %2930, %v412_v17   ;;  %785 = vperm.xlu0 %2929, %v411_v18  }
  0xc7   : > { %2729 = vmatmul.mubr.msk.f32.gmra.mxu0 %vm843_vm1, %v276_v19  ;;  %2815 = vmatmul.mubr.msk.f32.gmra.mxu1 %vm843_vm1, %v276_v19 }
  0xc8   : > { %1401 = vmatprep.mubr.f32.mxu0 %v3009_v16  ;;  %1970 = vmatprep.mubr.f32.mxu1 %v3009_v16 }
  0xc9   : > { %800 = vperm.xlu1 %2930, %v414_v20   ;;  %795 = vperm.xlu0 %2929, %v413_v21  }
  0xcb   : > { %2730 = vmatmul.mubr.msk.f32.gmra.mxu0 %vm843_vm1, %v277_v22  ;;  %2816 = vmatmul.mubr.msk.f32.gmra.mxu1 %vm843_vm1, %v277_v22 }
  0xcc   : > { %1407 = vmatprep.mubr.f32.mxu0 %v3009_v16  ;;  %1976 = vmatprep.mubr.f32.mxu1 %v3009_v16 }
  0xcd   : > { %810 = vperm.xlu1 %2930, %v416_v23   ;;  %805 = vperm.xlu0 %2929, %v415_v24   ;;  %v292_v23 = vld [vmem:[%s4359_s0 + $0x1a8] sm:$0xff] }
  0xcf   : > { %2731 = vmatmul.mubr.msk.f32.gmra.mxu0 %vm843_vm1, %v278_v25  ;;  %2817 = vmatmul.mubr.msk.f32.gmra.mxu1 %vm843_vm1, %v278_v25 }
  0xd0   : > { %1413 = vmatprep.mubr.f32.mxu0 %v3009_v16  ;;  %1982 = vmatprep.mubr.f32.mxu1 %v3009_v16 }
  0xd1   : > { %820 = vperm.xlu1 %2930, %v418_v26   ;;  %815 = vperm.xlu0 %2929, %v417_v27   ;;  %v451_v26 = vpop.permute.xlu1 %450 }
  0xd3   : > { %2732 = vmatmul.mubr.msk.f32.gmra.mxu0 %vm843_vm1, %v279_v28  ;;  %2818 = vmatmul.mubr.msk.f32.gmra.mxu1 %vm843_vm1, %v279_v28 }
  0xd4   : > { %1419 = vmatprep.mubr.f32.mxu0 %v3009_v16  ;;  %1988 = vmatprep.mubr.f32.mxu1 %v3009_v16 }
  0xd5   : > { %830 = vperm.xlu1 %2930, %v420_v29   ;;  %825 = vperm.xlu0 %2929, %v419_v30  }
  0xd7   : > { %2733 = vmatmul.mubr.msk.f32.gmra.mxu0 %vm843_vm1, %v280_v31  ;;  %2819 = vmatmul.mubr.msk.f32.gmra.mxu1 %vm843_vm1, %v280_v31 }
  0xd8   : > { %1425 = vmatprep.mubr.f32.mxu0 %v3009_v16  ;;  %1994 = vmatprep.mubr.f32.mxu1 %v3009_v16 }
  0xd9   : > { %840 = vperm.xlu1 %2930, %v422_v32   ;;  %835 = vperm.xlu0 %2929, %v421_v33   ;;  %v293_v33 = vld [vmem:[%s4359_s0 + $0x1b0] sm:$0xff] }
  0xdb   : > { %2734 = vmatmul.mubr.msk.f32.gmra.mxu0 %vm843_vm1, %v281_v34  ;;  %2820 = vmatmul.mubr.msk.f32.gmra.mxu1 %vm843_vm1, %v281_v34 }
  0xdc   : > { %1431 = vmatprep.mubr.f32.mxu0 %v3009_v16  ;;  %2000 = vmatprep.mubr.f32.mxu1 %v3009_v16 }
  0xdf   : > { %2735 = vmatmul.mubr.msk.f32.gmra.mxu0 %vm843_vm1, %v282_v35  ;;  %2821 = vmatmul.mubr.msk.f32.gmra.mxu1 %vm843_vm1, %v282_v35 }
  0xe0   : > { %1437 = vmatprep.mubr.f32.mxu0 %v3009_v16  ;;  %2006 = vmatprep.mubr.f32.mxu1 %v3009_v16 }
  0xe3   : > { %2736 = vmatmul.mubr.msk.f32.gmra.mxu0 %vm843_vm1, %v283_v36  ;;  %2822 = vmatmul.mubr.msk.f32.gmra.mxu1 %vm843_vm1, %v283_v36  ;;  %v456_v36 = vpop.permute.xlu0 %455 }
  0xe4   : > { %1443 = vmatprep.mubr.f32.mxu0 %v3009_v16  ;;  %2012 = vmatprep.mubr.f32.mxu1 %v3009_v16 }
  0xe7   : > { %2737 = vmatmul.mubr.msk.f32.gmra.mxu0 %vm843_vm1, %v284_v37  ;;  %2823 = vmatmul.mubr.msk.f32.gmra.mxu1 %vm843_vm1, %v284_v37 }
  0xe8   : > { %1449 = vmatprep.mubr.f32.mxu0 %v3009_v16  ;;  %2018 = vmatprep.mubr.f32.mxu1 %v3009_v16 }
  0xeb   : > { %2738 = vmatmul.mubr.msk.f32.gmra.mxu0 %vm843_vm1, %v285_v38  ;;  %2824 = vmatmul.mubr.msk.f32.gmra.mxu1 %vm843_vm1, %v285_v38 }
  0xec   : > { %1455 = vmatprep.mubr.f32.mxu0 %v3009_v16  ;;  %2024 = vmatprep.mubr.f32.mxu1 %v3009_v16 }
  0xef   : > { %2739 = vmatmul.mubr.msk.f32.gmra.mxu0 %vm843_vm1, %v286_v39  ;;  %2825 = vmatmul.mubr.msk.f32.gmra.mxu1 %vm843_vm1, %v286_v39 }
  0xf0   : > { %1461 = vmatprep.mubr.f32.mxu0 %v3009_v16  ;;  %2030 = vmatprep.mubr.f32.mxu1 %v3009_v16 }
  0xf3   : > { %v1175_v42 = vpop.f32.mrf.mxu0  ;;  %2740 = vmatmul.mubr.msk.f32.gmra.mxu0 %vm843_vm1, %v287_v41  ;;  %v1744_v43 = vpop.f32.mrf.mxu1  ;;  %2826 = vmatmul.mubr.msk.f32.gmra.mxu1 %vm843_vm1, %v287_v41 }
  0xf4   : > { %v1176_v44 = vadd.f32 %v1175_v42, %v426_v40  ;;  %v1745_v45 = vadd.f32 %v1744_v43, %v426_v40  ;;  %1467 = vmatprep.mubr.f32.mxu0 %v3009_v16  ;;  %2036 = vmatprep.mubr.f32.mxu1 %v3009_v16  ;;  %v294_v43 = vld [vmem:[%s4359_s0 + $0x1b8] sm:$0xff] }
  0xf5   : > { %v1177_v48 = vpop.f32.mrf.mxu0  ;;  %v1746_v49 = vpop.f32.mrf.mxu1 }
  0xf6   : > { %2247 = vst [vmem:[%s3726_s5] sm:$0xff] %v1176_v44  ;;  %2249 = vst [vmem:[%s3726_s5 + $0x10] sm:$0xff] %v1745_v45  ;;  %v1178_v50 = vadd.f32 %v1177_v48, %v426_v40  ;;  %v1747_v51 = vadd.f32 %v1746_v49, %v426_v40 }
  0xf7   : > { %v1181_v52 = vpop.f32.mrf.mxu0  ;;  %2741 = vmatmul.mubr.msk.f32.gmra.mxu0 %vm843_vm1, %v288_v47  ;;  %v1750_v53 = vpop.f32.mrf.mxu1  ;;  %2827 = vmatmul.mubr.msk.f32.gmra.mxu1 %vm843_vm1, %v288_v47 }
  0xf8   : > { %2248 = vst [vmem:[%s3726_s5 + $0x8] sm:$0xff] %v1178_v50  ;;  %2250 = vst [vmem:[%s3726_s5 + $0x18] sm:$0xff] %v1747_v51  ;;  %v1182_v54 = vadd.f32 %v1181_v52, %v431_v46  ;;  %v1751_v55 = vadd.f32 %v1750_v53, %v431_v46  ;;  %1473 = vmatprep.mubr.f32.mxu0 %v3009_v16  ;;  %2042 = vmatprep.mubr.f32.mxu1 %v3009_v16  ;;  %v295_v53 = vld [vmem:[%s4359_s0 + $0x1c0] sm:$0xff] }
  0xf9   : > { %v1183_v58 = vpop.f32.mrf.mxu0  ;;  %v1752_v59 = vpop.f32.mrf.mxu1 }
  0xfa   : > { %2251 = vst [vmem:[%s3726_s5 + $0x20] sm:$0xff] %v1182_v54  ;;  %2253 = vst [vmem:[%s3726_s5 + $0x30] sm:$0xff] %v1751_v55  ;;  %v1184_v60 = vadd.f32 %v1183_v58, %v431_v46  ;;  %v1753_v61 = vadd.f32 %v1752_v59, %v431_v46  ;;  %v461_v46 = vpop.permute.xlu1 %460 }
  0xfb   : > { %v1187_v62 = vpop.f32.mrf.mxu0  ;;  %2742 = vmatmul.mubr.msk.f32.gmra.mxu0 %vm843_vm1, %v289_v57  ;;  %v1756_v63 = vpop.f32.mrf.mxu1  ;;  %2828 = vmatmul.mubr.msk.f32.gmra.mxu1 %vm843_vm1, %v289_v57 }
  0xfc   : > { %2252 = vst [vmem:[%s3726_s5 + $0x28] sm:$0xff] %v1184_v60  ;;  %2254 = vst [vmem:[%s3726_s5 + $0x38] sm:$0xff] %v1753_v61  ;;  %v1188_v0 = vadd.f32 %v1187_v62, %v436_v56  ;;  %v1757_v1 = vadd.f32 %v1756_v63, %v436_v56  ;;  %1479 = vmatprep.mubr.f32.mxu0 %v3009_v16  ;;  %2048 = vmatprep.mubr.f32.mxu1 %v3009_v16  ;;  %v296_v63 = vld [vmem:[%s4359_s0 + $0x1c8] sm:$0xff] }
  0xfd   : > { %v1189_v3 = vpop.f32.mrf.mxu0  ;;  %v1758_v4 = vpop.f32.mrf.mxu1 }
  0xfe   : > { %2255 = vst [vmem:[%s3726_s5 + $0x40] sm:$0xff] %v1188_v0  ;;  %2257 = vst [vmem:[%s3726_s5 + $0x50] sm:$0xff] %v1757_v1  ;;  %v1190_v6 = vadd.f32 %v1189_v3, %v436_v56  ;;  %v1759_v7 = vadd.f32 %v1758_v4, %v436_v56  ;;  %v466_v56 = vpop.permute.xlu0 %465 }
  0xff   : > { %v1193_v8 = vpop.f32.mrf.mxu0  ;;  %2743 = vmatmul.mubr.msk.f32.gmra.mxu0 %vm843_vm1, %v290_v2  ;;  %v1762_v9 = vpop.f32.mrf.mxu1  ;;  %2829 = vmatmul.mubr.msk.f32.gmra.mxu1 %vm843_vm1, %v290_v2 }
 0x100   : > { %2256 = vst [vmem:[%s3726_s5 + $0x48] sm:$0xff] %v1190_v6  ;;  %2258 = vst [vmem:[%s3726_s5 + $0x58] sm:$0xff] %v1759_v7  ;;  %v1194_v10 = vadd.f32 %v1193_v8, %v441_v5  ;;  %v1763_v11 = vadd.f32 %v1762_v9, %v441_v5  ;;  %1485 = vmatprep.mubr.f32.mxu0 %v3009_v16  ;;  %2054 = vmatprep.mubr.f32.mxu1 %v3009_v16  ;;  %v471_v2 = vpop.permute.xlu1 %470  ;;  %v297_v9 = vld [vmem:[%s4359_s0 + $0x1d0] sm:$0xff] }
 0x101   : > { %v1195_v13 = vpop.f32.mrf.mxu0  ;;  %v1764_v14 = vpop.f32.mrf.mxu1 }
 0x102   : > { %2259 = vst [vmem:[%s3726_s5 + $0x60] sm:$0xff] %v1194_v10  ;;  %2261 = vst [vmem:[%s3726_s5 + $0x70] sm:$0xff] %v1763_v11  ;;  %v1196_v17 = vadd.f32 %v1195_v13, %v441_v5  ;;  %v1765_v18 = vadd.f32 %v1764_v14, %v441_v5 }
 0x103   : > { %v1199_v19 = vpop.f32.mrf.mxu0  ;;  %2744 = vmatmul.mubr.msk.f32.gmra.mxu0 %vm843_vm1, %v291_v12  ;;  %v1768_v20 = vpop.f32.mrf.mxu1  ;;  %2830 = vmatmul.mubr.msk.f32.gmra.mxu1 %vm843_vm1, %v291_v12 }
 0x104   : > { %2260 = vst [vmem:[%s3726_s5 + $0x68] sm:$0xff] %v1196_v17  ;;  %2262 = vst [vmem:[%s3726_s5 + $0x78] sm:$0xff] %v1765_v18  ;;  %v1200_v21 = vadd.f32 %v1199_v19, %v446_v15  ;;  %v1769_v22 = vadd.f32 %v1768_v20, %v446_v15  ;;  %1491 = vmatprep.mubr.f32.mxu0 %v3009_v16  ;;  %2060 = vmatprep.mubr.f32.mxu1 %v3009_v16  ;;  %v476_v12 = vpop.permute.xlu0 %475  ;;  %v298_v20 = vld [vmem:[%s4359_s0 + $0x1d8] sm:$0xff] }
 0x105   : > { %v1201_v24 = vpop.f32.mrf.mxu0  ;;  %v1770_v25 = vpop.f32.mrf.mxu1 }
 0x106   : > { %2263 = vst [vmem:[%s3726_s5 + $0x80] sm:$0xff] %v1200_v21  ;;  %2265 = vst [vmem:[%s3726_s5 + $0x90] sm:$0xff] %v1769_v22  ;;  %v1202_v27 = vadd.f32 %v1201_v24, %v446_v15  ;;  %v1771_v28 = vadd.f32 %v1770_v25, %v446_v15 }
 0x107   : > { %v1205_v29 = vpop.f32.mrf.mxu0  ;;  %2745 = vmatmul.mubr.msk.f32.gmra.mxu0 %vm843_vm1, %v292_v23  ;;  %v1774_v30 = vpop.f32.mrf.mxu1  ;;  %2831 = vmatmul.mubr.msk.f32.gmra.mxu1 %vm843_vm1, %v292_v23 }
 0x108   : > { %2264 = vst [vmem:[%s3726_s5 + $0x88] sm:$0xff] %v1202_v27  ;;  %2266 = vst [vmem:[%s3726_s5 + $0x98] sm:$0xff] %v1771_v28  ;;  %v1206_v31 = vadd.f32 %v1205_v29, %v451_v26  ;;  %v1775_v32 = vadd.f32 %v1774_v30, %v451_v26  ;;  %1497 = vmatprep.mubr.f32.mxu0 %v3009_v16  ;;  %2066 = vmatprep.mubr.f32.mxu1 %v3009_v16  ;;  %v481_v23 = vpop.permute.xlu1 %480  ;;  %v299_v30 = vld [vmem:[%s4359_s0 + $0x1e0] sm:$0xff] }
 0x109   : > { %v1207_v34 = vpop.f32.mrf.mxu0  ;;  %v1776_v35 = vpop.f32.mrf.mxu1 }
 0x10a   : > { %2267 = vst [vmem:[%s3726_s5 + $0xa0] sm:$0xff] %v1206_v31  ;;  %2269 = vst [vmem:[%s3726_s5 + $0xb0] sm:$0xff] %v1775_v32  ;;  %v1208_v37 = vadd.f32 %v1207_v34, %v451_v26  ;;  %v1777_v38 = vadd.f32 %v1776_v35, %v451_v26 }
 0x10b   : > { %v1211_v39 = vpop.f32.mrf.mxu0  ;;  %2746 = vmatmul.mubr.msk.f32.gmra.mxu0 %vm843_vm1, %v293_v33  ;;  %v1780_v40 = vpop.f32.mrf.mxu1  ;;  %2832 = vmatmul.mubr.msk.f32.gmra.mxu1 %vm843_vm1, %v293_v33 }
 0x10c   : > { %2268 = vst [vmem:[%s3726_s5 + $0xa8] sm:$0xff] %v1208_v37  ;;  %2270 = vst [vmem:[%s3726_s5 + $0xb8] sm:$0xff] %v1777_v38  ;;  %v1212_v41 = vadd.f32 %v1211_v39, %v456_v36  ;;  %v1781_v42 = vadd.f32 %v1780_v40, %v456_v36  ;;  %1503 = vmatprep.mubr.f32.mxu0 %v3009_v16  ;;  %2072 = vmatprep.mubr.f32.mxu1 %v3009_v16  ;;  %v486_v33 = vpop.permute.xlu0 %485  ;;  %v300_v40 = vld [vmem:[%s4359_s0 + $0x1e8] sm:$0xff] }
 0x10d   : > { %v1213_v44 = vpop.f32.mrf.mxu0  ;;  %v1782_v45 = vpop.f32.mrf.mxu1 }
 0x10e   : > { %2271 = vst [vmem:[%s3726_s5 + $0xc0] sm:$0xff] %v1212_v41  ;;  %2273 = vst [vmem:[%s3726_s5 + $0xd0] sm:$0xff] %v1781_v42  ;;  %v1214_v47 = vadd.f32 %v1213_v44, %v456_v36  ;;  %v1783_v48 = vadd.f32 %v1782_v45, %v456_v36 }
 0x10f   : > { %v1217_v49 = vpop.f32.mrf.mxu0  ;;  %2747 = vmatmul.mubr.msk.f32.gmra.mxu0 %vm843_vm1, %v294_v43  ;;  %v1786_v50 = vpop.f32.mrf.mxu1  ;;  %2833 = vmatmul.mubr.msk.f32.gmra.mxu1 %vm843_vm1, %v294_v43 }
 0x110   : > { %2272 = vst [vmem:[%s3726_s5 + $0xc8] sm:$0xff] %v1214_v47  ;;  %2274 = vst [vmem:[%s3726_s5 + $0xd8] sm:$0xff] %v1783_v48  ;;  %v1218_v51 = vadd.f32 %v1217_v49, %v461_v46  ;;  %v1787_v52 = vadd.f32 %v1786_v50, %v461_v46  ;;  %1509 = vmatprep.mubr.f32.mxu0 %v3009_v16  ;;  %2078 = vmatprep.mubr.f32.mxu1 %v3009_v16  ;;  %v491_v43 = vpop.permute.xlu1 %490  ;;  %v301_v50 = vld [vmem:[%s4359_s0 + $0x1f0] sm:$0xff] }
 0x111   : > { %v1219_v54 = vpop.f32.mrf.mxu0  ;;  %v1788_v55 = vpop.f32.mrf.mxu1 }
 0x112   : > { %2275 = vst [vmem:[%s3726_s5 + $0xe0] sm:$0xff] %v1218_v51  ;;  %2277 = vst [vmem:[%s3726_s5 + $0xf0] sm:$0xff] %v1787_v52  ;;  %v1220_v57 = vadd.f32 %v1219_v54, %v461_v46  ;;  %v1789_v58 = vadd.f32 %v1788_v55, %v461_v46 }
 0x113   : > { %v1223_v59 = vpop.f32.mrf.mxu0  ;;  %2748 = vmatmul.mubr.msk.f32.gmra.mxu0 %vm843_vm1, %v295_v53  ;;  %v1792_v60 = vpop.f32.mrf.mxu1  ;;  %2834 = vmatmul.mubr.msk.f32.gmra.mxu1 %vm843_vm1, %v295_v53 }
 0x114   : > { %2276 = vst [vmem:[%s3726_s5 + $0xe8] sm:$0xff] %v1220_v57  ;;  %2278 = vst [vmem:[%s3726_s5 + $0xf8] sm:$0xff] %v1789_v58  ;;  %v1224_v61 = vadd.f32 %v1223_v59, %v466_v56  ;;  %v1793_v62 = vadd.f32 %v1792_v60, %v466_v56  ;;  %1515 = vmatprep.mubr.f32.mxu0 %v3009_v16  ;;  %2084 = vmatprep.mubr.f32.mxu1 %v3009_v16  ;;  %v496_v53 = vpop.permute.xlu0 %495  ;;  %v302_v60 = vld [vmem:[%s4359_s0 + $0x1f8] sm:$0xff] }
 0x115   : > { %v1225_v0 = vpop.f32.mrf.mxu0  ;;  %v1794_v1 = vpop.f32.mrf.mxu1 }
 0x116   : > { %2279 = vst [vmem:[%s3726_s5 + $0x100] sm:$0xff] %v1224_v61  ;;  %2281 = vst [vmem:[%s3726_s5 + $0x110] sm:$0xff] %v1793_v62  ;;  %v1226_v3 = vadd.f32 %v1225_v0, %v466_v56  ;;  %v1795_v4 = vadd.f32 %v1794_v1, %v466_v56 }
 0x117   : > { %v1229_v5 = vpop.f32.mrf.mxu0  ;;  %2749 = vmatmul.mubr.msk.f32.gmra.mxu0 %vm843_vm1, %v296_v63  ;;  %v1798_v6 = vpop.f32.mrf.mxu1  ;;  %2835 = vmatmul.mubr.msk.f32.gmra.mxu1 %vm843_vm1, %v296_v63 }
 0x118   : > { %2280 = vst [vmem:[%s3726_s5 + $0x108] sm:$0xff] %v1226_v3  ;;  %2282 = vst [vmem:[%s3726_s5 + $0x118] sm:$0xff] %v1795_v4  ;;  %v1230_v7 = vadd.f32 %v1229_v5, %v471_v2  ;;  %v1799_v8 = vadd.f32 %v1798_v6, %v471_v2  ;;  %1521 = vmatprep.mubr.f32.mxu0 %v3009_v16  ;;  %2090 = vmatprep.mubr.f32.mxu1 %v3009_v16  ;;  %v501_v63 = vpop.permute.xlu1 %500  ;;  %v303_v6 = vld [vmem:[%s4359_s0 + $0x200] sm:$0xff] }
 0x119   : > { %v1231_v10 = vpop.f32.mrf.mxu0  ;;  %v1800_v11 = vpop.f32.mrf.mxu1 }
 0x11a   : > { %2283 = vst [vmem:[%s3726_s5 + $0x120] sm:$0xff] %v1230_v7  ;;  %2285 = vst [vmem:[%s3726_s5 + $0x130] sm:$0xff] %v1799_v8  ;;  %v1232_v13 = vadd.f32 %v1231_v10, %v471_v2  ;;  %v1801_v14 = vadd.f32 %v1800_v11, %v471_v2 }
 0x11b   : > { %v1235_v15 = vpop.f32.mrf.mxu0  ;;  %2750 = vmatmul.mubr.msk.f32.gmra.mxu0 %vm843_vm1, %v297_v9  ;;  %v1804_v17 = vpop.f32.mrf.mxu1  ;;  %2836 = vmatmul.mubr.msk.f32.gmra.mxu1 %vm843_vm1, %v297_v9 }
 0x11c   : > { %2284 = vst [vmem:[%s3726_s5 + $0x128] sm:$0xff] %v1232_v13  ;;  %2286 = vst [vmem:[%s3726_s5 + $0x138] sm:$0xff] %v1801_v14  ;;  %v1236_v18 = vadd.f32 %v1235_v15, %v476_v12  ;;  %v1805_v19 = vadd.f32 %v1804_v17, %v476_v12  ;;  %1527 = vmatprep.mubr.f32.mxu0 %v3009_v16  ;;  %2096 = vmatprep.mubr.f32.mxu1 %v3009_v16  ;;  %v506_v9 = vpop.permute.xlu0 %505  ;;  %v304_v17 = vld [vmem:[%s4359_s0 + $0x208] sm:$0xff] }
 0x11d   : > { %v1237_v21 = vpop.f32.mrf.mxu0  ;;  %v1806_v22 = vpop.f32.mrf.mxu1 }
 0x11e   : > { %2287 = vst [vmem:[%s3726_s5 + $0x140] sm:$0xff] %v1236_v18  ;;  %2289 = vst [vmem:[%s3726_s5 + $0x150] sm:$0xff] %v1805_v19  ;;  %v1238_v24 = vadd.f32 %v1237_v21, %v476_v12  ;;  %v1807_v25 = vadd.f32 %v1806_v22, %v476_v12 }
 0x11f   : > { %v1241_v26 = vpop.f32.mrf.mxu0  ;;  %2751 = vmatmul.mubr.msk.f32.gmra.mxu0 %vm843_vm1, %v298_v20  ;;  %v1810_v27 = vpop.f32.mrf.mxu1  ;;  %2837 = vmatmul.mubr.msk.f32.gmra.mxu1 %vm843_vm1, %v298_v20 }
 0x120   : > { %2288 = vst [vmem:[%s3726_s5 + $0x148] sm:$0xff] %v1238_v24  ;;  %2290 = vst [vmem:[%s3726_s5 + $0x158] sm:$0xff] %v1807_v25  ;;  %v1242_v28 = vadd.f32 %v1241_v26, %v481_v23  ;;  %v1811_v29 = vadd.f32 %v1810_v27, %v481_v23  ;;  %1533 = vmatprep.mubr.f32.mxu0 %v3009_v16  ;;  %2102 = vmatprep.mubr.f32.mxu1 %v3009_v16  ;;  %v511_v20 = vpop.permute.xlu1 %510  ;;  %v305_v27 = vld [vmem:[%s4359_s0 + $0x210] sm:$0xff] }
 0x121   : > { %v1243_v31 = vpop.f32.mrf.mxu0  ;;  %v1812_v32 = vpop.f32.mrf.mxu1 }
 0x122   : > { %2291 = vst [vmem:[%s3726_s5 + $0x160] sm:$0xff] %v1242_v28  ;;  %2293 = vst [vmem:[%s3726_s5 + $0x170] sm:$0xff] %v1811_v29  ;;  %v1244_v34 = vadd.f32 %v1243_v31, %v481_v23  ;;  %v1813_v35 = vadd.f32 %v1812_v32, %v481_v23 }
 0x123   : > { %v1247_v36 = vpop.f32.mrf.mxu0  ;;  %2752 = vmatmul.mubr.msk.f32.gmra.mxu0 %vm843_vm1, %v299_v30  ;;  %v1816_v37 = vpop.f32.mrf.mxu1  ;;  %2838 = vmatmul.mubr.msk.f32.gmra.mxu1 %vm843_vm1, %v299_v30 }
 0x124   : > { %2292 = vst [vmem:[%s3726_s5 + $0x168] sm:$0xff] %v1244_v34  ;;  %2294 = vst [vmem:[%s3726_s5 + $0x178] sm:$0xff] %v1813_v35  ;;  %v1248_v38 = vadd.f32 %v1247_v36, %v486_v33  ;;  %v1817_v39 = vadd.f32 %v1816_v37, %v486_v33  ;;  %1539 = vmatprep.mubr.f32.mxu0 %v3009_v16  ;;  %2108 = vmatprep.mubr.f32.mxu1 %v3009_v16  ;;  %v516_v30 = vpop.permute.xlu0 %515  ;;  %v306_v37 = vld [vmem:[%s4359_s0 + $0x218] sm:$0xff] }
 0x125   : > { %v1249_v41 = vpop.f32.mrf.mxu0  ;;  %v1818_v42 = vpop.f32.mrf.mxu1 }
 0x126   : > { %2295 = vst [vmem:[%s3726_s5 + $0x180] sm:$0xff] %v1248_v38  ;;  %2297 = vst [vmem:[%s3726_s5 + $0x190] sm:$0xff] %v1817_v39  ;;  %v1250_v44 = vadd.f32 %v1249_v41, %v486_v33  ;;  %v1819_v45 = vadd.f32 %v1818_v42, %v486_v33 }
 0x127   : > { %v1253_v46 = vpop.f32.mrf.mxu0  ;;  %2753 = vmatmul.mubr.msk.f32.gmra.mxu0 %vm843_vm1, %v300_v40  ;;  %v1822_v47 = vpop.f32.mrf.mxu1  ;;  %2839 = vmatmul.mubr.msk.f32.gmra.mxu1 %vm843_vm1, %v300_v40 }
 0x128   : > { %2296 = vst [vmem:[%s3726_s5 + $0x188] sm:$0xff] %v1250_v44  ;;  %2298 = vst [vmem:[%s3726_s5 + $0x198] sm:$0xff] %v1819_v45  ;;  %v1254_v48 = vadd.f32 %v1253_v46, %v491_v43  ;;  %v1823_v49 = vadd.f32 %v1822_v47, %v491_v43  ;;  %1545 = vmatprep.mubr.f32.mxu0 %v3009_v16  ;;  %2114 = vmatprep.mubr.f32.mxu1 %v3009_v16  ;;  %v521_v40 = vpop.permute.xlu1 %520  ;;  %v307_v47 = vld [vmem:[%s4359_s0 + $0x220] sm:$0xff] }
 0x129   : > { %v1255_v51 = vpop.f32.mrf.mxu0  ;;  %v1824_v52 = vpop.f32.mrf.mxu1 }
 0x12a   : > { %2299 = vst [vmem:[%s3726_s5 + $0x1a0] sm:$0xff] %v1254_v48  ;;  %2301 = vst [vmem:[%s3726_s5 + $0x1b0] sm:$0xff] %v1823_v49  ;;  %v1256_v54 = vadd.f32 %v1255_v51, %v491_v43  ;;  %v1825_v55 = vadd.f32 %v1824_v52, %v491_v43 }
 0x12b   : > { %v1259_v56 = vpop.f32.mrf.mxu0  ;;  %2754 = vmatmul.mubr.msk.f32.gmra.mxu0 %vm843_vm1, %v301_v50  ;;  %v1828_v57 = vpop.f32.mrf.mxu1  ;;  %2840 = vmatmul.mubr.msk.f32.gmra.mxu1 %vm843_vm1, %v301_v50 }
 0x12c   : > { %2300 = vst [vmem:[%s3726_s5 + $0x1a8] sm:$0xff] %v1256_v54  ;;  %2302 = vst [vmem:[%s3726_s5 + $0x1b8] sm:$0xff] %v1825_v55  ;;  %v1260_v58 = vadd.f32 %v1259_v56, %v496_v53  ;;  %v1829_v59 = vadd.f32 %v1828_v57, %v496_v53  ;;  %1551 = vmatprep.mubr.f32.mxu0 %v3009_v16  ;;  %2120 = vmatprep.mubr.f32.mxu1 %v3009_v16  ;;  %v526_v50 = vpop.permute.xlu0 %525  ;;  %v308_v57 = vld [vmem:[%s4359_s0 + $0x228] sm:$0xff] }
 0x12d   : > { %v1261_v61 = vpop.f32.mrf.mxu0  ;;  %v1830_v62 = vpop.f32.mrf.mxu1 }
 0x12e   : > { %2303 = vst [vmem:[%s3726_s5 + $0x1c0] sm:$0xff] %v1260_v58  ;;  %2305 = vst [vmem:[%s3726_s5 + $0x1d0] sm:$0xff] %v1829_v59  ;;  %v1262_v0 = vadd.f32 %v1261_v61, %v496_v53  ;;  %v1831_v1 = vadd.f32 %v1830_v62, %v496_v53 }
 0x12f   : > { %v1265_v2 = vpop.f32.mrf.mxu0  ;;  %2755 = vmatmul.mubr.msk.f32.gmra.mxu0 %vm843_vm1, %v302_v60  ;;  %v1834_v3 = vpop.f32.mrf.mxu1  ;;  %2841 = vmatmul.mubr.msk.f32.gmra.mxu1 %vm843_vm1, %v302_v60 }
 0x130   : > { %2304 = vst [vmem:[%s3726_s5 + $0x1c8] sm:$0xff] %v1262_v0  ;;  %2306 = vst [vmem:[%s3726_s5 + $0x1d8] sm:$0xff] %v1831_v1  ;;  %v1266_v4 = vadd.f32 %v1265_v2, %v501_v63  ;;  %v1835_v5 = vadd.f32 %v1834_v3, %v501_v63  ;;  %1557 = vmatprep.mubr.f32.mxu0 %v3009_v16  ;;  %2126 = vmatprep.mubr.f32.mxu1 %v3009_v16  ;;  %v531_v60 = vpop.permute.xlu1 %530  ;;  %v309_v3 = vld [vmem:[%s4359_s0 + $0x230] sm:$0xff] }
 0x131   : > { %v1267_v7 = vpop.f32.mrf.mxu0  ;;  %v1836_v8 = vpop.f32.mrf.mxu1 }
 0x132   : > { %2307 = vst [vmem:[%s3726_s5 + $0x1e0] sm:$0xff] %v1266_v4  ;;  %2309 = vst [vmem:[%s3726_s5 + $0x1f0] sm:$0xff] %v1835_v5  ;;  %v1268_v10 = vadd.f32 %v1267_v7, %v501_v63  ;;  %v1837_v11 = vadd.f32 %v1836_v8, %v501_v63 }
 0x133   : > { %v1271_v12 = vpop.f32.mrf.mxu0  ;;  %2756 = vmatmul.mubr.msk.f32.gmra.mxu0 %vm843_vm1, %v303_v6  ;;  %v1840_v13 = vpop.f32.mrf.mxu1  ;;  %2842 = vmatmul.mubr.msk.f32.gmra.mxu1 %vm843_vm1, %v303_v6 }
 0x134   : > { %2308 = vst [vmem:[%s3726_s5 + $0x1e8] sm:$0xff] %v1268_v10  ;;  %2310 = vst [vmem:[%s3726_s5 + $0x1f8] sm:$0xff] %v1837_v11  ;;  %v1272_v14 = vadd.f32 %v1271_v12, %v506_v9  ;;  %v1841_v15 = vadd.f32 %v1840_v13, %v506_v9  ;;  %1563 = vmatprep.mubr.f32.mxu0 %v3009_v16  ;;  %2132 = vmatprep.mubr.f32.mxu1 %v3009_v16  ;;  %v536_v6 = vpop.permute.xlu0 %535  ;;  %v310_v13 = vld [vmem:[%s4359_s0 + $0x238] sm:$0xff] }
 0x135   : > { %v1273_v18 = vpop.f32.mrf.mxu0  ;;  %v1842_v19 = vpop.f32.mrf.mxu1 }
 0x136   : > { %2311 = vst [vmem:[%s3726_s5 + $0x200] sm:$0xff] %v1272_v14  ;;  %2313 = vst [vmem:[%s3726_s5 + $0x210] sm:$0xff] %v1841_v15  ;;  %v1274_v21 = vadd.f32 %v1273_v18, %v506_v9  ;;  %v1843_v22 = vadd.f32 %v1842_v19, %v506_v9 }
 0x137   : > { %v1277_v23 = vpop.f32.mrf.mxu0  ;;  %2757 = vmatmul.mubr.msk.f32.gmra.mxu0 %vm843_vm1, %v304_v17  ;;  %v1846_v24 = vpop.f32.mrf.mxu1  ;;  %2843 = vmatmul.mubr.msk.f32.gmra.mxu1 %vm843_vm1, %v304_v17 }
 0x138   : > { %2312 = vst [vmem:[%s3726_s5 + $0x208] sm:$0xff] %v1274_v21  ;;  %2314 = vst [vmem:[%s3726_s5 + $0x218] sm:$0xff] %v1843_v22  ;;  %v1278_v25 = vadd.f32 %v1277_v23, %v511_v20  ;;  %v1847_v26 = vadd.f32 %v1846_v24, %v511_v20  ;;  %1569 = vmatprep.mubr.f32.mxu0 %v3009_v16  ;;  %2138 = vmatprep.mubr.f32.mxu1 %v3009_v16  ;;  %v541_v17 = vpop.permute.xlu1 %540  ;;  %v311_v24 = vld [vmem:[%s4359_s0 + $0x240] sm:$0xff] }
 0x139   : > { %v1279_v28 = vpop.f32.mrf.mxu0  ;;  %v1848_v29 = vpop.f32.mrf.mxu1 }
 0x13a   : > { %2315 = vst [vmem:[%s3726_s5 + $0x220] sm:$0xff] %v1278_v25  ;;  %2317 = vst [vmem:[%s3726_s5 + $0x230] sm:$0xff] %v1847_v26  ;;  %v1280_v31 = vadd.f32 %v1279_v28, %v511_v20  ;;  %v1849_v32 = vadd.f32 %v1848_v29, %v511_v20 }
 0x13b   : > { %v1283_v33 = vpop.f32.mrf.mxu0  ;;  %2758 = vmatmul.mubr.msk.f32.gmra.mxu0 %vm843_vm1, %v305_v27  ;;  %v1852_v34 = vpop.f32.mrf.mxu1  ;;  %2844 = vmatmul.mubr.msk.f32.gmra.mxu1 %vm843_vm1, %v305_v27 }
 0x13c   : > { %2316 = vst [vmem:[%s3726_s5 + $0x228] sm:$0xff] %v1280_v31  ;;  %2318 = vst [vmem:[%s3726_s5 + $0x238] sm:$0xff] %v1849_v32  ;;  %v1284_v35 = vadd.f32 %v1283_v33, %v516_v30  ;;  %v1853_v36 = vadd.f32 %v1852_v34, %v516_v30  ;;  %1575 = vmatprep.mubr.f32.mxu0 %v3009_v16  ;;  %2144 = vmatprep.mubr.f32.mxu1 %v3009_v16  ;;  %v546_v27 = vpop.permute.xlu0 %545  ;;  %v312_v34 = vld [vmem:[%s4359_s0 + $0x248] sm:$0xff] }
 0x13d   : > { %v1285_v38 = vpop.f32.mrf.mxu0  ;;  %v1854_v39 = vpop.f32.mrf.mxu1 }
 0x13e   : > { %2319 = vst [vmem:[%s3726_s5 + $0x240] sm:$0xff] %v1284_v35  ;;  %2321 = vst [vmem:[%s3726_s5 + $0x250] sm:$0xff] %v1853_v36  ;;  %v1286_v41 = vadd.f32 %v1285_v38, %v516_v30  ;;  %v1855_v42 = vadd.f32 %v1854_v39, %v516_v30 }
 0x13f   : > { %v1289_v43 = vpop.f32.mrf.mxu0  ;;  %2759 = vmatmul.mubr.msk.f32.gmra.mxu0 %vm843_vm1, %v306_v37  ;;  %v1858_v44 = vpop.f32.mrf.mxu1  ;;  %2845 = vmatmul.mubr.msk.f32.gmra.mxu1 %vm843_vm1, %v306_v37 }
 0x140   : > { %2320 = vst [vmem:[%s3726_s5 + $0x248] sm:$0xff] %v1286_v41  ;;  %2322 = vst [vmem:[%s3726_s5 + $0x258] sm:$0xff] %v1855_v42  ;;  %v1290_v45 = vadd.f32 %v1289_v43, %v521_v40  ;;  %v1859_v46 = vadd.f32 %v1858_v44, %v521_v40  ;;  %1581 = vmatprep.mubr.f32.mxu0 %v3009_v16  ;;  %2150 = vmatprep.mubr.f32.mxu1 %v3009_v16  ;;  %v551_v37 = vpop.permute.xlu1 %550  ;;  %v313_v44 = vld [vmem:[%s4359_s0 + $0x250] sm:$0xff] }
 0x141   : > { %v1291_v48 = vpop.f32.mrf.mxu0  ;;  %v1860_v49 = vpop.f32.mrf.mxu1 }
 0x142   : > { %2323 = vst [vmem:[%s3726_s5 + $0x260] sm:$0xff] %v1290_v45  ;;  %2325 = vst [vmem:[%s3726_s5 + $0x270] sm:$0xff] %v1859_v46  ;;  %v1292_v51 = vadd.f32 %v1291_v48, %v521_v40  ;;  %v1861_v52 = vadd.f32 %v1860_v49, %v521_v40 }
 0x143   : > { %v1295_v53 = vpop.f32.mrf.mxu0  ;;  %2760 = vmatmul.mubr.msk.f32.gmra.mxu0 %vm843_vm1, %v307_v47  ;;  %v1864_v54 = vpop.f32.mrf.mxu1  ;;  %2846 = vmatmul.mubr.msk.f32.gmra.mxu1 %vm843_vm1, %v307_v47 }
 0x144   : > { %2324 = vst [vmem:[%s3726_s5 + $0x268] sm:$0xff] %v1292_v51  ;;  %2326 = vst [vmem:[%s3726_s5 + $0x278] sm:$0xff] %v1861_v52  ;;  %v1296_v55 = vadd.f32 %v1295_v53, %v526_v50  ;;  %v1865_v56 = vadd.f32 %v1864_v54, %v526_v50  ;;  %1587 = vmatprep.mubr.f32.mxu0 %v3009_v16  ;;  %2156 = vmatprep.mubr.f32.mxu1 %v3009_v16  ;;  %v556_v47 = vpop.permute.xlu0 %555  ;;  %v314_v54 = vld [vmem:[%s4359_s0 + $0x258] sm:$0xff] }
 0x145   : > { %v1297_v58 = vpop.f32.mrf.mxu0  ;;  %v1866_v59 = vpop.f32.mrf.mxu1 }
 0x146   : > { %2327 = vst [vmem:[%s3726_s5 + $0x280] sm:$0xff] %v1296_v55  ;;  %2329 = vst [vmem:[%s3726_s5 + $0x290] sm:$0xff] %v1865_v56  ;;  %v1298_v61 = vadd.f32 %v1297_v58, %v526_v50  ;;  %v1867_v62 = vadd.f32 %v1866_v59, %v526_v50 }
 0x147   : > { %v1301_v63 = vpop.f32.mrf.mxu0  ;;  %2761 = vmatmul.mubr.msk.f32.gmra.mxu0 %vm843_vm1, %v308_v57  ;;  %v1870_v0 = vpop.f32.mrf.mxu1  ;;  %2847 = vmatmul.mubr.msk.f32.gmra.mxu1 %vm843_vm1, %v308_v57 }
 0x148   : > { %2328 = vst [vmem:[%s3726_s5 + $0x288] sm:$0xff] %v1298_v61  ;;  %2330 = vst [vmem:[%s3726_s5 + $0x298] sm:$0xff] %v1867_v62  ;;  %v1302_v1 = vadd.f32 %v1301_v63, %v531_v60  ;;  %v1871_v2 = vadd.f32 %v1870_v0, %v531_v60  ;;  %1593 = vmatprep.mubr.f32.mxu0 %v3009_v16  ;;  %2162 = vmatprep.mubr.f32.mxu1 %v3009_v16  ;;  %v561_v57 = vpop.permute.xlu1 %560  ;;  %v315_v0 = vld [vmem:[%s4359_s0 + $0x260] sm:$0xff] }
 0x149   : > { %v1303_v4 = vpop.f32.mrf.mxu0  ;;  %v1872_v5 = vpop.f32.mrf.mxu1 }
 0x14a   : > { %2331 = vst [vmem:[%s3726_s5 + $0x2a0] sm:$0xff] %v1302_v1  ;;  %2333 = vst [vmem:[%s3726_s5 + $0x2b0] sm:$0xff] %v1871_v2  ;;  %v1304_v7 = vadd.f32 %v1303_v4, %v531_v60  ;;  %v1873_v8 = vadd.f32 %v1872_v5, %v531_v60 }
 0x14b   : > { %v1307_v9 = vpop.f32.mrf.mxu0  ;;  %2762 = vmatmul.mubr.msk.f32.gmra.mxu0 %vm843_vm1, %v309_v3  ;;  %v1876_v10 = vpop.f32.mrf.mxu1  ;;  %2848 = vmatmul.mubr.msk.f32.gmra.mxu1 %vm843_vm1, %v309_v3 }
 0x14c   : > { %2332 = vst [vmem:[%s3726_s5 + $0x2a8] sm:$0xff] %v1304_v7  ;;  %2334 = vst [vmem:[%s3726_s5 + $0x2b8] sm:$0xff] %v1873_v8  ;;  %v1308_v11 = vadd.f32 %v1307_v9, %v536_v6  ;;  %v1877_v12 = vadd.f32 %v1876_v10, %v536_v6  ;;  %1599 = vmatprep.mubr.f32.mxu0 %v3009_v16  ;;  %2168 = vmatprep.mubr.f32.mxu1 %v3009_v16  ;;  %v566_v3 = vpop.permute.xlu0 %565  ;;  %v316_v10 = vld [vmem:[%s4359_s0 + $0x268] sm:$0xff] }
 0x14d   : > { %v1309_v14 = vpop.f32.mrf.mxu0  ;;  %v1878_v15 = vpop.f32.mrf.mxu1 }
 0x14e   : > { %2335 = vst [vmem:[%s3726_s5 + $0x2c0] sm:$0xff] %v1308_v11  ;;  %2337 = vst [vmem:[%s3726_s5 + $0x2d0] sm:$0xff] %v1877_v12  ;;  %v1310_v18 = vadd.f32 %v1309_v14, %v536_v6  ;;  %v1879_v19 = vadd.f32 %v1878_v15, %v536_v6 }
 0x14f   : > { %v1313_v20 = vpop.f32.mrf.mxu0  ;;  %2763 = vmatmul.mubr.msk.f32.gmra.mxu0 %vm843_vm1, %v310_v13  ;;  %v1882_v21 = vpop.f32.mrf.mxu1  ;;  %2849 = vmatmul.mubr.msk.f32.gmra.mxu1 %vm843_vm1, %v310_v13 }
 0x150   : > { %2336 = vst [vmem:[%s3726_s5 + $0x2c8] sm:$0xff] %v1310_v18  ;;  %2338 = vst [vmem:[%s3726_s5 + $0x2d8] sm:$0xff] %v1879_v19  ;;  %v1314_v22 = vadd.f32 %v1313_v20, %v541_v17  ;;  %v1883_v23 = vadd.f32 %v1882_v21, %v541_v17  ;;  %1605 = vmatprep.mubr.f32.mxu0 %v3009_v16  ;;  %2174 = vmatprep.mubr.f32.mxu1 %v3009_v16  ;;  %v571_v13 = vpop.permute.xlu1 %570  ;;  %v317_v21 = vld [vmem:[%s4359_s0 + $0x270] sm:$0xff] }
 0x151   : > { %v1315_v25 = vpop.f32.mrf.mxu0  ;;  %v1884_v26 = vpop.f32.mrf.mxu1 }
 0x152   : > { %2339 = vst [vmem:[%s3726_s5 + $0x2e0] sm:$0xff] %v1314_v22  ;;  %2341 = vst [vmem:[%s3726_s5 + $0x2f0] sm:$0xff] %v1883_v23  ;;  %v1316_v28 = vadd.f32 %v1315_v25, %v541_v17  ;;  %v1885_v29 = vadd.f32 %v1884_v26, %v541_v17 }
 0x153   : > { %v1319_v30 = vpop.f32.mrf.mxu0  ;;  %2764 = vmatmul.mubr.msk.f32.gmra.mxu0 %vm843_vm1, %v311_v24  ;;  %v1888_v31 = vpop.f32.mrf.mxu1  ;;  %2850 = vmatmul.mubr.msk.f32.gmra.mxu1 %vm843_vm1, %v311_v24 }
 0x154   : > { %2340 = vst [vmem:[%s3726_s5 + $0x2e8] sm:$0xff] %v1316_v28  ;;  %2342 = vst [vmem:[%s3726_s5 + $0x2f8] sm:$0xff] %v1885_v29  ;;  %v1320_v32 = vadd.f32 %v1319_v30, %v546_v27  ;;  %v1889_v33 = vadd.f32 %v1888_v31, %v546_v27  ;;  %1611 = vmatprep.mubr.f32.mxu0 %v3009_v16  ;;  %2180 = vmatprep.mubr.f32.mxu1 %v3009_v16  ;;  %v576_v24 = vpop.permute.xlu0 %575  ;;  %v318_v31 = vld [vmem:[%s4359_s0 + $0x278] sm:$0xff] }
 0x155   : > { %v1321_v35 = vpop.f32.mrf.mxu0  ;;  %v1890_v36 = vpop.f32.mrf.mxu1 }
 0x156   : > { %2343 = vst [vmem:[%s3726_s5 + $0x300] sm:$0xff] %v1320_v32  ;;  %2345 = vst [vmem:[%s3726_s5 + $0x310] sm:$0xff] %v1889_v33  ;;  %v1322_v38 = vadd.f32 %v1321_v35, %v546_v27  ;;  %v1891_v39 = vadd.f32 %v1890_v36, %v546_v27 }
 0x157   : > { %v1325_v40 = vpop.f32.mrf.mxu0  ;;  %2765 = vmatmul.mubr.msk.f32.gmra.mxu0 %vm843_vm1, %v312_v34  ;;  %v1894_v41 = vpop.f32.mrf.mxu1  ;;  %2851 = vmatmul.mubr.msk.f32.gmra.mxu1 %vm843_vm1, %v312_v34 }
 0x158   : > { %2344 = vst [vmem:[%s3726_s5 + $0x308] sm:$0xff] %v1322_v38  ;;  %2346 = vst [vmem:[%s3726_s5 + $0x318] sm:$0xff] %v1891_v39  ;;  %v1326_v42 = vadd.f32 %v1325_v40, %v551_v37  ;;  %v1895_v43 = vadd.f32 %v1894_v41, %v551_v37  ;;  %1617 = vmatprep.mubr.f32.mxu0 %v3009_v16  ;;  %2186 = vmatprep.mubr.f32.mxu1 %v3009_v16  ;;  %v581_v34 = vpop.permute.xlu1 %580  ;;  %v319_v41 = vld [vmem:[%s4359_s0 + $0x280] sm:$0xff] }
 0x159   : > { %v1327_v45 = vpop.f32.mrf.mxu0  ;;  %v1896_v46 = vpop.f32.mrf.mxu1 }
 0x15a   : > { %2347 = vst [vmem:[%s3726_s5 + $0x320] sm:$0xff] %v1326_v42  ;;  %2349 = vst [vmem:[%s3726_s5 + $0x330] sm:$0xff] %v1895_v43  ;;  %v1328_v48 = vadd.f32 %v1327_v45, %v551_v37  ;;  %v1897_v49 = vadd.f32 %v1896_v46, %v551_v37 }
 0x15b   : > { %v1331_v50 = vpop.f32.mrf.mxu0  ;;  %2766 = vmatmul.mubr.msk.f32.gmra.mxu0 %vm843_vm1, %v313_v44  ;;  %v1900_v51 = vpop.f32.mrf.mxu1  ;;  %2852 = vmatmul.mubr.msk.f32.gmra.mxu1 %vm843_vm1, %v313_v44 }
 0x15c   : > { %2348 = vst [vmem:[%s3726_s5 + $0x328] sm:$0xff] %v1328_v48  ;;  %2350 = vst [vmem:[%s3726_s5 + $0x338] sm:$0xff] %v1897_v49  ;;  %v1332_v52 = vadd.f32 %v1331_v50, %v556_v47  ;;  %v1901_v53 = vadd.f32 %v1900_v51, %v556_v47  ;;  %1623 = vmatprep.mubr.f32.mxu0 %v3009_v16  ;;  %2192 = vmatprep.mubr.f32.mxu1 %v3009_v16  ;;  %v586_v44 = vpop.permute.xlu0 %585  ;;  %v320_v51 = vld [vmem:[%s4359_s0 + $0x288] sm:$0xff] }
 0x15d   : > { %v1333_v55 = vpop.f32.mrf.mxu0  ;;  %v1902_v56 = vpop.f32.mrf.mxu1 }
 0x15e   : > { %2351 = vst [vmem:[%s3726_s5 + $0x340] sm:$0xff] %v1332_v52  ;;  %2353 = vst [vmem:[%s3726_s5 + $0x350] sm:$0xff] %v1901_v53  ;;  %v1334_v58 = vadd.f32 %v1333_v55, %v556_v47  ;;  %v1903_v59 = vadd.f32 %v1902_v56, %v556_v47 }
 0x15f   : > { %v1337_v60 = vpop.f32.mrf.mxu0  ;;  %2767 = vmatmul.mubr.msk.f32.gmra.mxu0 %vm843_vm1, %v314_v54  ;;  %v1906_v61 = vpop.f32.mrf.mxu1  ;;  %2853 = vmatmul.mubr.msk.f32.gmra.mxu1 %vm843_vm1, %v314_v54 }
 0x160   : > { %2352 = vst [vmem:[%s3726_s5 + $0x348] sm:$0xff] %v1334_v58  ;;  %2354 = vst [vmem:[%s3726_s5 + $0x358] sm:$0xff] %v1903_v59  ;;  %v1338_v62 = vadd.f32 %v1337_v60, %v561_v57  ;;  %v1907_v63 = vadd.f32 %v1906_v61, %v561_v57  ;;  %1629 = vmatprep.mubr.f32.mxu0 %v3009_v16  ;;  %2198 = vmatprep.mubr.f32.mxu1 %v3009_v16  ;;  %v591_v54 = vpop.permute.xlu1 %590  ;;  %v321_v61 = vld [vmem:[%s4359_s0 + $0x290] sm:$0xff] }
 0x161   : > { %v1339_v1 = vpop.f32.mrf.mxu0  ;;  %v1908_v2 = vpop.f32.mrf.mxu1 }
 0x162   : > { %2355 = vst [vmem:[%s3726_s5 + $0x360] sm:$0xff] %v1338_v62  ;;  %2357 = vst [vmem:[%s3726_s5 + $0x370] sm:$0xff] %v1907_v63  ;;  %v1340_v4 = vadd.f32 %v1339_v1, %v561_v57  ;;  %v1909_v5 = vadd.f32 %v1908_v2, %v561_v57 }
 0x163   : > { %v1343_v6 = vpop.f32.mrf.mxu0  ;;  %2768 = vmatmul.mubr.msk.f32.gmra.mxu0 %vm843_vm1, %v315_v0  ;;  %v1912_v7 = vpop.f32.mrf.mxu1  ;;  %2854 = vmatmul.mubr.msk.f32.gmra.mxu1 %vm843_vm1, %v315_v0 }
 0x164   : > { %2356 = vst [vmem:[%s3726_s5 + $0x368] sm:$0xff] %v1340_v4  ;;  %2358 = vst [vmem:[%s3726_s5 + $0x378] sm:$0xff] %v1909_v5  ;;  %v1344_v8 = vadd.f32 %v1343_v6, %v566_v3  ;;  %v1913_v9 = vadd.f32 %v1912_v7, %v566_v3  ;;  %1635 = vmatprep.mubr.f32.mxu0 %v3009_v16  ;;  %2204 = vmatprep.mubr.f32.mxu1 %v3009_v16  ;;  %v596_v0 = vpop.permute.xlu0 %595  ;;  %v322_v7 = vld [vmem:[%s4359_s0 + $0x298] sm:$0xff] }
 0x165   : > { %v1345_v11 = vpop.f32.mrf.mxu0  ;;  %v1914_v12 = vpop.f32.mrf.mxu1 }
 0x166   : > { %2359 = vst [vmem:[%s3726_s5 + $0x380] sm:$0xff] %v1344_v8  ;;  %2361 = vst [vmem:[%s3726_s5 + $0x390] sm:$0xff] %v1913_v9  ;;  %v1346_v14 = vadd.f32 %v1345_v11, %v566_v3  ;;  %v1915_v15 = vadd.f32 %v1914_v12, %v566_v3 }
 0x167   : > { %v1349_v17 = vpop.f32.mrf.mxu0  ;;  %2769 = vmatmul.mubr.msk.f32.gmra.mxu0 %vm843_vm1, %v316_v10  ;;  %v1918_v18 = vpop.f32.mrf.mxu1  ;;  %2855 = vmatmul.mubr.msk.f32.gmra.mxu1 %vm843_vm1, %v316_v10 }
 0x168   : > { %2360 = vst [vmem:[%s3726_s5 + $0x388] sm:$0xff] %v1346_v14  ;;  %2362 = vst [vmem:[%s3726_s5 + $0x398] sm:$0xff] %v1915_v15  ;;  %v1350_v19 = vadd.f32 %v1349_v17, %v571_v13  ;;  %v1919_v20 = vadd.f32 %v1918_v18, %v571_v13  ;;  %1641 = vmatprep.mubr.f32.mxu0 %v3009_v16  ;;  %2210 = vmatprep.mubr.f32.mxu1 %v3009_v16  ;;  %v601_v10 = vpop.permute.xlu1 %600 }
 0x169   : > { %v1351_v22 = vpop.f32.mrf.mxu0  ;;  %v1920_v23 = vpop.f32.mrf.mxu1 }
 0x16a   : > { %2363 = vst [vmem:[%s3726_s5 + $0x3a0] sm:$0xff] %v1350_v19  ;;  %2365 = vst [vmem:[%s3726_s5 + $0x3b0] sm:$0xff] %v1919_v20  ;;  %v1352_v25 = vadd.f32 %v1351_v22, %v571_v13  ;;  %v1921_v26 = vadd.f32 %v1920_v23, %v571_v13  ;;  %v606_v19 = vpop.permute.xlu0 %605 }
 0x16b   : > { %v1355_v27 = vpop.f32.mrf.mxu0  ;;  %2770 = vmatmul.mubr.msk.f32.gmra.mxu0 %vm843_vm1, %v317_v21  ;;  %v1924_v28 = vpop.f32.mrf.mxu1  ;;  %2856 = vmatmul.mubr.msk.f32.gmra.mxu1 %vm843_vm1, %v317_v21 }
 0x16c   : > { %2364 = vst [vmem:[%s3726_s5 + $0x3a8] sm:$0xff] %v1352_v25  ;;  %2366 = vst [vmem:[%s3726_s5 + $0x3b8] sm:$0xff] %v1921_v26  ;;  %v1356_v29 = vadd.f32 %v1355_v27, %v576_v24  ;;  %v1925_v30 = vadd.f32 %v1924_v28, %v576_v24  ;;  %1647 = vmatprep.mubr.f32.mxu0 %v3009_v16  ;;  %2216 = vmatprep.mubr.f32.mxu1 %v3009_v16  ;;  %v611_v28 = vpop.permute.xlu1 %610 }
 0x16d   : > { %v1357_v32 = vpop.f32.mrf.mxu0  ;;  %v1926_v33 = vpop.f32.mrf.mxu1 }
 0x16e   : > { %2367 = vst [vmem:[%s3726_s5 + $0x3c0] sm:$0xff] %v1356_v29  ;;  %2369 = vst [vmem:[%s3726_s5 + $0x3d0] sm:$0xff] %v1925_v30  ;;  %v1358_v35 = vadd.f32 %v1357_v32, %v576_v24  ;;  %v1927_v36 = vadd.f32 %v1926_v33, %v576_v24 }
 0x16f   : > { %v1361_v37 = vpop.f32.mrf.mxu0  ;;  %2771 = vmatmul.mubr.msk.f32.gmra.mxu0 %vm843_vm1, %v318_v31  ;;  %v1930_v38 = vpop.f32.mrf.mxu1  ;;  %2857 = vmatmul.mubr.msk.f32.gmra.mxu1 %vm843_vm1, %v318_v31 }
 0x170   : > { %2368 = vst [vmem:[%s3726_s5 + $0x3c8] sm:$0xff] %v1358_v35  ;;  %2370 = vst [vmem:[%s3726_s5 + $0x3d8] sm:$0xff] %v1927_v36  ;;  %v1362_v39 = vadd.f32 %v1361_v37, %v581_v34  ;;  %v1931_v40 = vadd.f32 %v1930_v38, %v581_v34  ;;  %1653 = vmatprep.mubr.f32.mxu0 %v3009_v16  ;;  %2222 = vmatprep.mubr.f32.mxu1 %v3009_v16  ;;  %v616_v37 = vpop.permute.xlu0 %615 }
 0x171   : > { %v1363_v42 = vpop.f32.mrf.mxu0  ;;  %v1932_v43 = vpop.f32.mrf.mxu1 }
 0x172   : > { %2371 = vst [vmem:[%s3726_s5 + $0x3e0] sm:$0xff] %v1362_v39  ;;  %2373 = vst [vmem:[%s3726_s5 + $0x3f0] sm:$0xff] %v1931_v40  ;;  %v1364_v45 = vadd.f32 %v1363_v42, %v581_v34  ;;  %v1933_v46 = vadd.f32 %v1932_v43, %v581_v34 }
 0x173   : > { %v1367_v47 = vpop.f32.mrf.mxu0  ;;  %2772 = vmatmul.mubr.msk.f32.gmra.mxu0 %vm843_vm1, %v319_v41  ;;  %v1936_v48 = vpop.f32.mrf.mxu1  ;;  %2858 = vmatmul.mubr.msk.f32.gmra.mxu1 %vm843_vm1, %v319_v41 }
 0x174   : > { %2372 = vst [vmem:[%s3726_s5 + $0x3e8] sm:$0xff] %v1364_v45  ;;  %2374 = vst [vmem:[%s3726_s5 + $0x3f8] sm:$0xff] %v1933_v46  ;;  %v1368_v49 = vadd.f32 %v1367_v47, %v586_v44  ;;  %v1937_v50 = vadd.f32 %v1936_v48, %v586_v44  ;;  %1659 = vmatprep.mubr.f32.mxu0 %v3009_v16  ;;  %2228 = vmatprep.mubr.f32.mxu1 %v3009_v16  ;;  %v621_v46 = vpop.permute.xlu1 %620 }
 0x175   : > { %v1369_v52 = vpop.f32.mrf.mxu0  ;;  %v1938_v53 = vpop.f32.mrf.mxu1 }
 0x176   : > { %2375 = vst [vmem:[%s3726_s5 + $0x400] sm:$0xff] %v1368_v49  ;;  %2377 = vst [vmem:[%s3726_s5 + $0x410] sm:$0xff] %v1937_v50  ;;  %v1370_v55 = vadd.f32 %v1369_v52, %v586_v44  ;;  %v1939_v56 = vadd.f32 %v1938_v53, %v586_v44 }
 0x177   : > { %v1373_v57 = vpop.f32.mrf.mxu0  ;;  %2773 = vmatmul.mubr.msk.f32.gmra.mxu0 %vm843_vm1, %v320_v51  ;;  %v1942_v58 = vpop.f32.mrf.mxu1  ;;  %2859 = vmatmul.mubr.msk.f32.gmra.mxu1 %vm843_vm1, %v320_v51 }
 0x178   : > { %2376 = vst [vmem:[%s3726_s5 + $0x408] sm:$0xff] %v1370_v55  ;;  %2378 = vst [vmem:[%s3726_s5 + $0x418] sm:$0xff] %v1939_v56  ;;  %v1374_v59 = vadd.f32 %v1373_v57, %v591_v54  ;;  %v1943_v60 = vadd.f32 %v1942_v58, %v591_v54  ;;  %1665 = vmatprep.mubr.f32.mxu0 %v3009_v16  ;;  %2234 = vmatprep.mubr.f32.mxu1 %v3009_v16  ;;  %v626_v55 = vpop.permute.xlu0 %625 }
 0x179   : > { %v1375_v62 = vpop.f32.mrf.mxu0  ;;  %v1944_v63 = vpop.f32.mrf.mxu1 }
 0x17a   : > { %2379 = vst [vmem:[%s3726_s5 + $0x420] sm:$0xff] %v1374_v59  ;;  %2381 = vst [vmem:[%s3726_s5 + $0x430] sm:$0xff] %v1943_v60  ;;  %v1376_v1 = vadd.f32 %v1375_v62, %v591_v54  ;;  %v1945_v2 = vadd.f32 %v1944_v63, %v591_v54 }
 0x17b   : > { %v1379_v3 = vpop.f32.mrf.mxu0  ;;  %2774 = vmatmul.mubr.msk.f32.gmra.mxu0 %vm843_vm1, %v321_v61  ;;  %v1948_v4 = vpop.f32.mrf.mxu1  ;;  %2860 = vmatmul.mubr.msk.f32.gmra.mxu1 %vm843_vm1, %v321_v61 }
 0x17c   : > { %2380 = vst [vmem:[%s3726_s5 + $0x428] sm:$0xff] %v1376_v1  ;;  %2382 = vst [vmem:[%s3726_s5 + $0x438] sm:$0xff] %v1945_v2  ;;  %v1380_v5 = vadd.f32 %v1379_v3, %v596_v0  ;;  %v1949_v6 = vadd.f32 %v1948_v4, %v596_v0  ;;  %1671 = vmatprep.mubr.f32.mxu0 %v3009_v16  ;;  %2240 = vmatprep.mubr.f32.mxu1 %v3009_v16 }
 0x17d   : > { %v1381_v8 = vpop.f32.mrf.mxu0  ;;  %v1950_v9 = vpop.f32.mrf.mxu1 }
 0x17e   : > { %2383 = vst [vmem:[%s3726_s5 + $0x440] sm:$0xff] %v1380_v5  ;;  %2385 = vst [vmem:[%s3726_s5 + $0x450] sm:$0xff] %v1949_v6  ;;  %v1382_v11 = vadd.f32 %v1381_v8, %v596_v0  ;;  %v1951_v12 = vadd.f32 %v1950_v9, %v596_v0  ;;  %v631_v0 = vpop.permute.xlu1 %630  ;;  %v636_v9 = vpop.permute.xlu0 %635 }
 0x17f   : > { %v1385_v13 = vpop.f32.mrf.mxu0  ;;  %2775 = vmatmul.mubr.msk.f32.gmra.mxu0 %vm843_vm1, %v322_v7  ;;  %v1954_v14 = vpop.f32.mrf.mxu1  ;;  %2861 = vmatmul.mubr.msk.f32.gmra.mxu1 %vm843_vm1, %v322_v7 }
 0x180   : > { %2384 = vst [vmem:[%s3726_s5 + $0x448] sm:$0xff] %v1382_v11  ;;  %2386 = vst [vmem:[%s3726_s5 + $0x458] sm:$0xff] %v1951_v12  ;;  %v1386_v16 = vadd.f32 %v1385_v13, %v601_v10  ;;  %v1955_v15 = vadd.f32 %v1954_v14, %v601_v10 }
 0x181   : > { %v1387_v17 = vpop.f32.mrf.mxu0  ;;  %v1956_v18 = vpop.f32.mrf.mxu1 }
 0x182   : > { %2387 = vst [vmem:[%s3726_s5 + $0x460] sm:$0xff] %v1386_v16  ;;  %2389 = vst [vmem:[%s3726_s5 + $0x470] sm:$0xff] %v1955_v15  ;;  %v1388_v20 = vadd.f32 %v1387_v17, %v601_v10  ;;  %v1957_v21 = vadd.f32 %v1956_v18, %v601_v10  ;;  %v641_v18 = vpop.permute.xlu1 %640 }
 0x183   : > { %v1391_v22 = vpop.f32.mrf.mxu0  ;;  %v1960_v23 = vpop.f32.mrf.mxu1 }
 0x184   : > { %2388 = vst [vmem:[%s3726_s5 + $0x468] sm:$0xff] %v1388_v20  ;;  %2390 = vst [vmem:[%s3726_s5 + $0x478] sm:$0xff] %v1957_v21  ;;  %v1392_v24 = vadd.f32 %v1391_v22, %v606_v19  ;;  %v1961_v25 = vadd.f32 %v1960_v23, %v606_v19 }
 0x185   : > { %v1393_v26 = vpop.f32.mrf.mxu0  ;;  %v1962_v27 = vpop.f32.mrf.mxu1 }
 0x186   : > { %2391 = vst [vmem:[%s3726_s5 + $0x480] sm:$0xff] %v1392_v24  ;;  %2393 = vst [vmem:[%s3726_s5 + $0x490] sm:$0xff] %v1961_v25  ;;  %v1394_v29 = vadd.f32 %v1393_v26, %v606_v19  ;;  %v1963_v30 = vadd.f32 %v1962_v27, %v606_v19  ;;  %v646_v27 = vpop.permute.xlu0 %645 }
 0x187   : > { %v1397_v31 = vpop.f32.mrf.mxu0  ;;  %v1966_v32 = vpop.f32.mrf.mxu1 }
 0x188   : > { %2392 = vst [vmem:[%s3726_s5 + $0x488] sm:$0xff] %v1394_v29  ;;  %2394 = vst [vmem:[%s3726_s5 + $0x498] sm:$0xff] %v1963_v30  ;;  %v1398_v33 = vadd.f32 %v1397_v31, %v611_v28  ;;  %v1967_v34 = vadd.f32 %v1966_v32, %v611_v28 }
 0x189   : > { %v1399_v35 = vpop.f32.mrf.mxu0  ;;  %v1968_v36 = vpop.f32.mrf.mxu1 }
 0x18a   : > { %2395 = vst [vmem:[%s3726_s5 + $0x4a0] sm:$0xff] %v1398_v33  ;;  %2397 = vst [vmem:[%s3726_s5 + $0x4b0] sm:$0xff] %v1967_v34  ;;  %v1400_v38 = vadd.f32 %v1399_v35, %v611_v28  ;;  %v1969_v39 = vadd.f32 %v1968_v36, %v611_v28  ;;  %v651_v36 = vpop.permute.xlu1 %650 }
 0x18b   : > { %v1403_v40 = vpop.f32.mrf.mxu0  ;;  %v1972_v41 = vpop.f32.mrf.mxu1 }
 0x18c   : > { %2396 = vst [vmem:[%s3726_s5 + $0x4a8] sm:$0xff] %v1400_v38  ;;  %2398 = vst [vmem:[%s3726_s5 + $0x4b8] sm:$0xff] %v1969_v39  ;;  %v1404_v42 = vadd.f32 %v1403_v40, %v616_v37  ;;  %v1973_v43 = vadd.f32 %v1972_v41, %v616_v37 }
 0x18d   : > { %v1405_v44 = vpop.f32.mrf.mxu0  ;;  %v1974_v45 = vpop.f32.mrf.mxu1 }
 0x18e   : > { %2399 = vst [vmem:[%s3726_s5 + $0x4c0] sm:$0xff] %v1404_v42  ;;  %2401 = vst [vmem:[%s3726_s5 + $0x4d0] sm:$0xff] %v1973_v43  ;;  %v1406_v47 = vadd.f32 %v1405_v44, %v616_v37  ;;  %v1975_v48 = vadd.f32 %v1974_v45, %v616_v37  ;;  %v656_v45 = vpop.permute.xlu0 %655 }
 0x18f   : > { %v1409_v49 = vpop.f32.mrf.mxu0  ;;  %v1978_v50 = vpop.f32.mrf.mxu1 }
 0x190   : > { %2400 = vst [vmem:[%s3726_s5 + $0x4c8] sm:$0xff] %v1406_v47  ;;  %2402 = vst [vmem:[%s3726_s5 + $0x4d8] sm:$0xff] %v1975_v48  ;;  %v1410_v51 = vadd.f32 %v1409_v49, %v621_v46  ;;  %v1979_v52 = vadd.f32 %v1978_v50, %v621_v46 }
 0x191   : > { %v1411_v53 = vpop.f32.mrf.mxu0  ;;  %v1980_v54 = vpop.f32.mrf.mxu1 }
 0x192   : > { %2403 = vst [vmem:[%s3726_s5 + $0x4e0] sm:$0xff] %v1410_v51  ;;  %2405 = vst [vmem:[%s3726_s5 + $0x4f0] sm:$0xff] %v1979_v52  ;;  %v1412_v56 = vadd.f32 %v1411_v53, %v621_v46  ;;  %v1981_v57 = vadd.f32 %v1980_v54, %v621_v46  ;;  %v661_v54 = vpop.permute.xlu1 %660 }
 0x193   : > { %v1415_v58 = vpop.f32.mrf.mxu0  ;;  %v1984_v59 = vpop.f32.mrf.mxu1 }
 0x194   : > { %2404 = vst [vmem:[%s3726_s5 + $0x4e8] sm:$0xff] %v1412_v56  ;;  %2406 = vst [vmem:[%s3726_s5 + $0x4f8] sm:$0xff] %v1981_v57  ;;  %v1416_v60 = vadd.f32 %v1415_v58, %v626_v55  ;;  %v1985_v61 = vadd.f32 %v1984_v59, %v626_v55 }
 0x195   : > { %v1417_v62 = vpop.f32.mrf.mxu0  ;;  %v1986_v63 = vpop.f32.mrf.mxu1 }
 0x196   : > { %2407 = vst [vmem:[%s3726_s5 + $0x500] sm:$0xff] %v1416_v60  ;;  %2409 = vst [vmem:[%s3726_s5 + $0x510] sm:$0xff] %v1985_v61  ;;  %v1418_v1 = vadd.f32 %v1417_v62, %v626_v55  ;;  %v1987_v2 = vadd.f32 %v1986_v63, %v626_v55  ;;  %v666_v63 = vpop.permute.xlu0 %665 }
 0x197   : > { %v1421_v3 = vpop.f32.mrf.mxu0  ;;  %v1990_v4 = vpop.f32.mrf.mxu1 }
 0x198   : > { %2408 = vst [vmem:[%s3726_s5 + $0x508] sm:$0xff] %v1418_v1  ;;  %2410 = vst [vmem:[%s3726_s5 + $0x518] sm:$0xff] %v1987_v2  ;;  %v1422_v5 = vadd.f32 %v1421_v3, %v631_v0  ;;  %v1991_v6 = vadd.f32 %v1990_v4, %v631_v0 }
 0x199   : > { %v1423_v7 = vpop.f32.mrf.mxu0  ;;  %v1992_v8 = vpop.f32.mrf.mxu1 }
 0x19a   : > { %2411 = vst [vmem:[%s3726_s5 + $0x520] sm:$0xff] %v1422_v5  ;;  %2413 = vst [vmem:[%s3726_s5 + $0x530] sm:$0xff] %v1991_v6  ;;  %v1424_v10 = vadd.f32 %v1423_v7, %v631_v0  ;;  %v1993_v11 = vadd.f32 %v1992_v8, %v631_v0  ;;  %v671_v8 = vpop.permute.xlu1 %670 }
 0x19b   : > { %v1427_v12 = vpop.f32.mrf.mxu0  ;;  %v1996_v13 = vpop.f32.mrf.mxu1 }
 0x19c   : > { %2412 = vst [vmem:[%s3726_s5 + $0x528] sm:$0xff] %v1424_v10  ;;  %2414 = vst [vmem:[%s3726_s5 + $0x538] sm:$0xff] %v1993_v11  ;;  %v1428_v14 = vadd.f32 %v1427_v12, %v636_v9  ;;  %v1997_v16 = vadd.f32 %v1996_v13, %v636_v9 }
 0x19d   : > { %v1429_v15 = vpop.f32.mrf.mxu0  ;;  %v1998_v17 = vpop.f32.mrf.mxu1 }
 0x19e   : > { %2415 = vst [vmem:[%s3726_s5 + $0x540] sm:$0xff] %v1428_v14  ;;  %2417 = vst [vmem:[%s3726_s5 + $0x550] sm:$0xff] %v1997_v16  ;;  %v1430_v19 = vadd.f32 %v1429_v15, %v636_v9  ;;  %v1999_v20 = vadd.f32 %v1998_v17, %v636_v9  ;;  %v676_v17 = vpop.permute.xlu0 %675 }
 0x19f   : > { %v1433_v21 = vpop.f32.mrf.mxu0  ;;  %v2002_v22 = vpop.f32.mrf.mxu1 }
 0x1a0   : > { %2416 = vst [vmem:[%s3726_s5 + $0x548] sm:$0xff] %v1430_v19  ;;  %2418 = vst [vmem:[%s3726_s5 + $0x558] sm:$0xff] %v1999_v20  ;;  %v1434_v23 = vadd.f32 %v1433_v21, %v641_v18  ;;  %v2003_v24 = vadd.f32 %v2002_v22, %v641_v18 }
 0x1a1   : > { %v1435_v25 = vpop.f32.mrf.mxu0  ;;  %v2004_v26 = vpop.f32.mrf.mxu1 }
 0x1a2   : > { %2419 = vst [vmem:[%s3726_s5 + $0x560] sm:$0xff] %v1434_v23  ;;  %2421 = vst [vmem:[%s3726_s5 + $0x570] sm:$0xff] %v2003_v24  ;;  %v1436_v28 = vadd.f32 %v1435_v25, %v641_v18  ;;  %v2005_v29 = vadd.f32 %v2004_v26, %v641_v18  ;;  %v681_v26 = vpop.permute.xlu1 %680 }
 0x1a3   : > { %v1439_v30 = vpop.f32.mrf.mxu0  ;;  %v2008_v31 = vpop.f32.mrf.mxu1 }
 0x1a4   : > { %2420 = vst [vmem:[%s3726_s5 + $0x568] sm:$0xff] %v1436_v28  ;;  %2422 = vst [vmem:[%s3726_s5 + $0x578] sm:$0xff] %v2005_v29  ;;  %v1440_v32 = vadd.f32 %v1439_v30, %v646_v27  ;;  %v2009_v33 = vadd.f32 %v2008_v31, %v646_v27 }
 0x1a5   : > { %v1441_v34 = vpop.f32.mrf.mxu0  ;;  %v2010_v35 = vpop.f32.mrf.mxu1 }
 0x1a6   : > { %2423 = vst [vmem:[%s3726_s5 + $0x580] sm:$0xff] %v1440_v32  ;;  %2425 = vst [vmem:[%s3726_s5 + $0x590] sm:$0xff] %v2009_v33  ;;  %v1442_v37 = vadd.f32 %v1441_v34, %v646_v27  ;;  %v2011_v38 = vadd.f32 %v2010_v35, %v646_v27  ;;  %v686_v35 = vpop.permute.xlu0 %685 }
 0x1a7   : > { %v1445_v39 = vpop.f32.mrf.mxu0  ;;  %v2014_v40 = vpop.f32.mrf.mxu1 }
 0x1a8   : > { %2424 = vst [vmem:[%s3726_s5 + $0x588] sm:$0xff] %v1442_v37  ;;  %2426 = vst [vmem:[%s3726_s5 + $0x598] sm:$0xff] %v2011_v38  ;;  %v1446_v41 = vadd.f32 %v1445_v39, %v651_v36  ;;  %v2015_v42 = vadd.f32 %v2014_v40, %v651_v36 }
 0x1a9   : > { %v1447_v43 = vpop.f32.mrf.mxu0  ;;  %v2016_v44 = vpop.f32.mrf.mxu1 }
 0x1aa   : > { %2427 = vst [vmem:[%s3726_s5 + $0x5a0] sm:$0xff] %v1446_v41  ;;  %2429 = vst [vmem:[%s3726_s5 + $0x5b0] sm:$0xff] %v2015_v42  ;;  %v1448_v46 = vadd.f32 %v1447_v43, %v651_v36  ;;  %v2017_v47 = vadd.f32 %v2016_v44, %v651_v36  ;;  %v691_v44 = vpop.permute.xlu1 %690 }
 0x1ab   : > { %v1451_v48 = vpop.f32.mrf.mxu0  ;;  %v2020_v49 = vpop.f32.mrf.mxu1 }
 0x1ac   : > { %2428 = vst [vmem:[%s3726_s5 + $0x5a8] sm:$0xff] %v1448_v46  ;;  %2430 = vst [vmem:[%s3726_s5 + $0x5b8] sm:$0xff] %v2017_v47  ;;  %v1452_v50 = vadd.f32 %v1451_v48, %v656_v45  ;;  %v2021_v51 = vadd.f32 %v2020_v49, %v656_v45 }
 0x1ad   : > { %v1453_v52 = vpop.f32.mrf.mxu0  ;;  %v2022_v53 = vpop.f32.mrf.mxu1 }
 0x1ae   : > { %2431 = vst [vmem:[%s3726_s5 + $0x5c0] sm:$0xff] %v1452_v50  ;;  %2433 = vst [vmem:[%s3726_s5 + $0x5d0] sm:$0xff] %v2021_v51  ;;  %v1454_v55 = vadd.f32 %v1453_v52, %v656_v45  ;;  %v2023_v56 = vadd.f32 %v2022_v53, %v656_v45  ;;  %v696_v53 = vpop.permute.xlu0 %695 }
 0x1af   : > { %v1457_v57 = vpop.f32.mrf.mxu0  ;;  %v2026_v58 = vpop.f32.mrf.mxu1 }
 0x1b0   : > { %2432 = vst [vmem:[%s3726_s5 + $0x5c8] sm:$0xff] %v1454_v55  ;;  %2434 = vst [vmem:[%s3726_s5 + $0x5d8] sm:$0xff] %v2023_v56  ;;  %v1458_v59 = vadd.f32 %v1457_v57, %v661_v54  ;;  %v2027_v60 = vadd.f32 %v2026_v58, %v661_v54 }
 0x1b1   : > { %v1459_v61 = vpop.f32.mrf.mxu0  ;;  %v2028_v62 = vpop.f32.mrf.mxu1 }
 0x1b2   : > { %2435 = vst [vmem:[%s3726_s5 + $0x5e0] sm:$0xff] %v1458_v59  ;;  %2437 = vst [vmem:[%s3726_s5 + $0x5f0] sm:$0xff] %v2027_v60  ;;  %v1460_v0 = vadd.f32 %v1459_v61, %v661_v54  ;;  %v2029_v1 = vadd.f32 %v2028_v62, %v661_v54  ;;  %v701_v62 = vpop.permute.xlu1 %700 }
 0x1b3   : > { %v1463_v2 = vpop.f32.mrf.mxu0  ;;  %v2032_v3 = vpop.f32.mrf.mxu1 }
 0x1b4   : > { %2436 = vst [vmem:[%s3726_s5 + $0x5e8] sm:$0xff] %v1460_v0  ;;  %2438 = vst [vmem:[%s3726_s5 + $0x5f8] sm:$0xff] %v2029_v1  ;;  %v1464_v4 = vadd.f32 %v1463_v2, %v666_v63  ;;  %v2033_v5 = vadd.f32 %v2032_v3, %v666_v63 }
 0x1b5   : > { %v1465_v6 = vpop.f32.mrf.mxu0  ;;  %v2034_v7 = vpop.f32.mrf.mxu1 }
 0x1b6   : > { %2439 = vst [vmem:[%s3726_s5 + $0x600] sm:$0xff] %v1464_v4  ;;  %2441 = vst [vmem:[%s3726_s5 + $0x610] sm:$0xff] %v2033_v5  ;;  %v1466_v9 = vadd.f32 %v1465_v6, %v666_v63  ;;  %v2035_v10 = vadd.f32 %v2034_v7, %v666_v63  ;;  %v706_v7 = vpop.permute.xlu0 %705 }
 0x1b7   : > { %v1469_v11 = vpop.f32.mrf.mxu0  ;;  %v2038_v12 = vpop.f32.mrf.mxu1 }
 0x1b8   : > { %2440 = vst [vmem:[%s3726_s5 + $0x608] sm:$0xff] %v1466_v9  ;;  %2442 = vst [vmem:[%s3726_s5 + $0x618] sm:$0xff] %v2035_v10  ;;  %v1470_v13 = vadd.f32 %v1469_v11, %v671_v8  ;;  %v2039_v14 = vadd.f32 %v2038_v12, %v671_v8 }
 0x1b9   : > { %v1471_v16 = vpop.f32.mrf.mxu0  ;;  %v2040_v15 = vpop.f32.mrf.mxu1 }
 0x1ba   : > { %2443 = vst [vmem:[%s3726_s5 + $0x620] sm:$0xff] %v1470_v13  ;;  %2445 = vst [vmem:[%s3726_s5 + $0x630] sm:$0xff] %v2039_v14  ;;  %v1472_v18 = vadd.f32 %v1471_v16, %v671_v8  ;;  %v2041_v19 = vadd.f32 %v2040_v15, %v671_v8  ;;  %v711_v15 = vpop.permute.xlu1 %710 }
 0x1bb   : > { %v1475_v20 = vpop.f32.mrf.mxu0  ;;  %v2044_v21 = vpop.f32.mrf.mxu1 }
 0x1bc   : > { %2444 = vst [vmem:[%s3726_s5 + $0x628] sm:$0xff] %v1472_v18  ;;  %2446 = vst [vmem:[%s3726_s5 + $0x638] sm:$0xff] %v2041_v19  ;;  %v1476_v22 = vadd.f32 %v1475_v20, %v676_v17  ;;  %v2045_v23 = vadd.f32 %v2044_v21, %v676_v17 }
 0x1bd   : > { %v1477_v24 = vpop.f32.mrf.mxu0  ;;  %v2046_v25 = vpop.f32.mrf.mxu1 }
 0x1be   : > { %2447 = vst [vmem:[%s3726_s5 + $0x640] sm:$0xff] %v1476_v22  ;;  %2449 = vst [vmem:[%s3726_s5 + $0x650] sm:$0xff] %v2045_v23  ;;  %v1478_v27 = vadd.f32 %v1477_v24, %v676_v17  ;;  %v2047_v28 = vadd.f32 %v2046_v25, %v676_v17  ;;  %v716_v25 = vpop.permute.xlu0 %715 }
 0x1bf   : > { %v1481_v29 = vpop.f32.mrf.mxu0  ;;  %v2050_v30 = vpop.f32.mrf.mxu1 }
 0x1c0   : > { %2448 = vst [vmem:[%s3726_s5 + $0x648] sm:$0xff] %v1478_v27  ;;  %2450 = vst [vmem:[%s3726_s5 + $0x658] sm:$0xff] %v2047_v28  ;;  %v1482_v31 = vadd.f32 %v1481_v29, %v681_v26  ;;  %v2051_v32 = vadd.f32 %v2050_v30, %v681_v26 }
 0x1c1   : > { %v1483_v33 = vpop.f32.mrf.mxu0  ;;  %v2052_v34 = vpop.f32.mrf.mxu1 }
 0x1c2   : > { %2451 = vst [vmem:[%s3726_s5 + $0x660] sm:$0xff] %v1482_v31  ;;  %2453 = vst [vmem:[%s3726_s5 + $0x670] sm:$0xff] %v2051_v32  ;;  %v1484_v36 = vadd.f32 %v1483_v33, %v681_v26  ;;  %v2053_v37 = vadd.f32 %v2052_v34, %v681_v26  ;;  %v721_v34 = vpop.permute.xlu1 %720 }
 0x1c3   : > { %v1487_v38 = vpop.f32.mrf.mxu0  ;;  %v2056_v39 = vpop.f32.mrf.mxu1 }
 0x1c4   : > { %2452 = vst [vmem:[%s3726_s5 + $0x668] sm:$0xff] %v1484_v36  ;;  %2454 = vst [vmem:[%s3726_s5 + $0x678] sm:$0xff] %v2053_v37  ;;  %v1488_v40 = vadd.f32 %v1487_v38, %v686_v35  ;;  %v2057_v41 = vadd.f32 %v2056_v39, %v686_v35 }
 0x1c5   : > { %v1489_v42 = vpop.f32.mrf.mxu0  ;;  %v2058_v43 = vpop.f32.mrf.mxu1 }
 0x1c6   : > { %2455 = vst [vmem:[%s3726_s5 + $0x680] sm:$0xff] %v1488_v40  ;;  %2457 = vst [vmem:[%s3726_s5 + $0x690] sm:$0xff] %v2057_v41  ;;  %v1490_v45 = vadd.f32 %v1489_v42, %v686_v35  ;;  %v2059_v46 = vadd.f32 %v2058_v43, %v686_v35  ;;  %v726_v43 = vpop.permute.xlu0 %725 }
 0x1c7   : > { %v1493_v47 = vpop.f32.mrf.mxu0  ;;  %v2062_v48 = vpop.f32.mrf.mxu1 }
 0x1c8   : > { %2456 = vst [vmem:[%s3726_s5 + $0x688] sm:$0xff] %v1490_v45  ;;  %2458 = vst [vmem:[%s3726_s5 + $0x698] sm:$0xff] %v2059_v46  ;;  %v1494_v49 = vadd.f32 %v1493_v47, %v691_v44  ;;  %v2063_v50 = vadd.f32 %v2062_v48, %v691_v44 }
 0x1c9   : > { %v1495_v51 = vpop.f32.mrf.mxu0  ;;  %v2064_v52 = vpop.f32.mrf.mxu1 }
 0x1ca   : > { %2459 = vst [vmem:[%s3726_s5 + $0x6a0] sm:$0xff] %v1494_v49  ;;  %2461 = vst [vmem:[%s3726_s5 + $0x6b0] sm:$0xff] %v2063_v50  ;;  %v1496_v54 = vadd.f32 %v1495_v51, %v691_v44  ;;  %v2065_v55 = vadd.f32 %v2064_v52, %v691_v44  ;;  %v731_v52 = vpop.permute.xlu1 %730 }
 0x1cb   : > { %v1499_v56 = vpop.f32.mrf.mxu0  ;;  %v2068_v57 = vpop.f32.mrf.mxu1 }
 0x1cc   : > { %2460 = vst [vmem:[%s3726_s5 + $0x6a8] sm:$0xff] %v1496_v54  ;;  %2462 = vst [vmem:[%s3726_s5 + $0x6b8] sm:$0xff] %v2065_v55  ;;  %v1500_v58 = vadd.f32 %v1499_v56, %v696_v53  ;;  %v2069_v59 = vadd.f32 %v2068_v57, %v696_v53 }
 0x1cd   : > { %v1501_v60 = vpop.f32.mrf.mxu0  ;;  %v2070_v61 = vpop.f32.mrf.mxu1 }
 0x1ce   : > { %2463 = vst [vmem:[%s3726_s5 + $0x6c0] sm:$0xff] %v1500_v58  ;;  %2465 = vst [vmem:[%s3726_s5 + $0x6d0] sm:$0xff] %v2069_v59  ;;  %v1502_v63 = vadd.f32 %v1501_v60, %v696_v53  ;;  %v2071_v0 = vadd.f32 %v2070_v61, %v696_v53  ;;  %v736_v61 = vpop.permute.xlu0 %735 }
 0x1cf   : > { %v1505_v1 = vpop.f32.mrf.mxu0  ;;  %v2074_v2 = vpop.f32.mrf.mxu1 }
 0x1d0   : > { %2464 = vst [vmem:[%s3726_s5 + $0x6c8] sm:$0xff] %v1502_v63  ;;  %2466 = vst [vmem:[%s3726_s5 + $0x6d8] sm:$0xff] %v2071_v0  ;;  %v1506_v3 = vadd.f32 %v1505_v1, %v701_v62  ;;  %v2075_v4 = vadd.f32 %v2074_v2, %v701_v62 }
 0x1d1   : > { %v1507_v5 = vpop.f32.mrf.mxu0  ;;  %v2076_v6 = vpop.f32.mrf.mxu1 }
 0x1d2   : > { %2467 = vst [vmem:[%s3726_s5 + $0x6e0] sm:$0xff] %v1506_v3  ;;  %2469 = vst [vmem:[%s3726_s5 + $0x6f0] sm:$0xff] %v2075_v4  ;;  %v1508_v8 = vadd.f32 %v1507_v5, %v701_v62  ;;  %v2077_v9 = vadd.f32 %v2076_v6, %v701_v62  ;;  %v741_v6 = vpop.permute.xlu1 %740 }
 0x1d3   : > { %v1511_v10 = vpop.f32.mrf.mxu0  ;;  %v2080_v11 = vpop.f32.mrf.mxu1 }
 0x1d4   : > { %2468 = vst [vmem:[%s3726_s5 + $0x6e8] sm:$0xff] %v1508_v8  ;;  %2470 = vst [vmem:[%s3726_s5 + $0x6f8] sm:$0xff] %v2077_v9  ;;  %v1512_v12 = vadd.f32 %v1511_v10, %v706_v7  ;;  %v2081_v13 = vadd.f32 %v2080_v11, %v706_v7 }
 0x1d5   : > { %v1513_v14 = vpop.f32.mrf.mxu0  ;;  %v2082_v16 = vpop.f32.mrf.mxu1 }
 0x1d6   : > { %2471 = vst [vmem:[%s3726_s5 + $0x700] sm:$0xff] %v1512_v12  ;;  %2473 = vst [vmem:[%s3726_s5 + $0x710] sm:$0xff] %v2081_v13  ;;  %v1514_v17 = vadd.f32 %v1513_v14, %v706_v7  ;;  %v2083_v18 = vadd.f32 %v2082_v16, %v706_v7  ;;  %v746_v16 = vpop.permute.xlu0 %745 }
 0x1d7   : > { %v1517_v19 = vpop.f32.mrf.mxu0  ;;  %v2086_v20 = vpop.f32.mrf.mxu1 }
 0x1d8   : > { %2472 = vst [vmem:[%s3726_s5 + $0x708] sm:$0xff] %v1514_v17  ;;  %2474 = vst [vmem:[%s3726_s5 + $0x718] sm:$0xff] %v2083_v18  ;;  %v1518_v21 = vadd.f32 %v1517_v19, %v711_v15  ;;  %v2087_v22 = vadd.f32 %v2086_v20, %v711_v15 }
 0x1d9   : > { %v1519_v23 = vpop.f32.mrf.mxu0  ;;  %v2088_v24 = vpop.f32.mrf.mxu1 }
 0x1da   : > { %2475 = vst [vmem:[%s3726_s5 + $0x720] sm:$0xff] %v1518_v21  ;;  %2477 = vst [vmem:[%s3726_s5 + $0x730] sm:$0xff] %v2087_v22  ;;  %v1520_v26 = vadd.f32 %v1519_v23, %v711_v15  ;;  %v2089_v27 = vadd.f32 %v2088_v24, %v711_v15  ;;  %v751_v24 = vpop.permute.xlu1 %750 }
 0x1db   : > { %v1523_v28 = vpop.f32.mrf.mxu0  ;;  %v2092_v29 = vpop.f32.mrf.mxu1 }
 0x1dc   : > { %2476 = vst [vmem:[%s3726_s5 + $0x728] sm:$0xff] %v1520_v26  ;;  %2478 = vst [vmem:[%s3726_s5 + $0x738] sm:$0xff] %v2089_v27  ;;  %v1524_v30 = vadd.f32 %v1523_v28, %v716_v25  ;;  %v2093_v31 = vadd.f32 %v2092_v29, %v716_v25 }
 0x1dd   : > { %v1525_v32 = vpop.f32.mrf.mxu0  ;;  %v2094_v33 = vpop.f32.mrf.mxu1 }
 0x1de   : > { %2479 = vst [vmem:[%s3726_s5 + $0x740] sm:$0xff] %v1524_v30  ;;  %2481 = vst [vmem:[%s3726_s5 + $0x750] sm:$0xff] %v2093_v31  ;;  %v1526_v35 = vadd.f32 %v1525_v32, %v716_v25  ;;  %v2095_v36 = vadd.f32 %v2094_v33, %v716_v25  ;;  %v756_v33 = vpop.permute.xlu0 %755 }
 0x1df   : > { %v1529_v37 = vpop.f32.mrf.mxu0  ;;  %v2098_v38 = vpop.f32.mrf.mxu1 }
 0x1e0   : > { %2480 = vst [vmem:[%s3726_s5 + $0x748] sm:$0xff] %v1526_v35  ;;  %2482 = vst [vmem:[%s3726_s5 + $0x758] sm:$0xff] %v2095_v36  ;;  %v1530_v39 = vadd.f32 %v1529_v37, %v721_v34  ;;  %v2099_v40 = vadd.f32 %v2098_v38, %v721_v34 }
 0x1e1   : > { %v1531_v41 = vpop.f32.mrf.mxu0  ;;  %v2100_v42 = vpop.f32.mrf.mxu1 }
 0x1e2   : > { %2483 = vst [vmem:[%s3726_s5 + $0x760] sm:$0xff] %v1530_v39  ;;  %2485 = vst [vmem:[%s3726_s5 + $0x770] sm:$0xff] %v2099_v40  ;;  %v1532_v44 = vadd.f32 %v1531_v41, %v721_v34  ;;  %v2101_v45 = vadd.f32 %v2100_v42, %v721_v34  ;;  %v761_v42 = vpop.permute.xlu1 %760 }
 0x1e3   : > { %v1535_v46 = vpop.f32.mrf.mxu0  ;;  %v2104_v47 = vpop.f32.mrf.mxu1 }
 0x1e4   : > { %2484 = vst [vmem:[%s3726_s5 + $0x768] sm:$0xff] %v1532_v44  ;;  %2486 = vst [vmem:[%s3726_s5 + $0x778] sm:$0xff] %v2101_v45  ;;  %v1536_v48 = vadd.f32 %v1535_v46, %v726_v43  ;;  %v2105_v49 = vadd.f32 %v2104_v47, %v726_v43 }
 0x1e5   : > { %v1537_v50 = vpop.f32.mrf.mxu0  ;;  %v2106_v51 = vpop.f32.mrf.mxu1 }
 0x1e6   : > { %2487 = vst [vmem:[%s3726_s5 + $0x780] sm:$0xff] %v1536_v48  ;;  %2489 = vst [vmem:[%s3726_s5 + $0x790] sm:$0xff] %v2105_v49  ;;  %v1538_v53 = vadd.f32 %v1537_v50, %v726_v43  ;;  %v2107_v54 = vadd.f32 %v2106_v51, %v726_v43  ;;  %v766_v51 = vpop.permute.xlu0 %765 }
 0x1e7   : > { %v1541_v55 = vpop.f32.mrf.mxu0  ;;  %v2110_v56 = vpop.f32.mrf.mxu1 }
 0x1e8   : > { %2488 = vst [vmem:[%s3726_s5 + $0x788] sm:$0xff] %v1538_v53  ;;  %2490 = vst [vmem:[%s3726_s5 + $0x798] sm:$0xff] %v2107_v54  ;;  %v1542_v57 = vadd.f32 %v1541_v55, %v731_v52  ;;  %v2111_v58 = vadd.f32 %v2110_v56, %v731_v52 }
 0x1e9   : > { %v1543_v59 = vpop.f32.mrf.mxu0  ;;  %v2112_v60 = vpop.f32.mrf.mxu1 }
 0x1ea   : > { %2491 = vst [vmem:[%s3726_s5 + $0x7a0] sm:$0xff] %v1542_v57  ;;  %2493 = vst [vmem:[%s3726_s5 + $0x7b0] sm:$0xff] %v2111_v58  ;;  %v1544_v62 = vadd.f32 %v1543_v59, %v731_v52  ;;  %v2113_v63 = vadd.f32 %v2112_v60, %v731_v52  ;;  %v771_v60 = vpop.permute.xlu1 %770 }
 0x1eb   : > { %v1547_v0 = vpop.f32.mrf.mxu0  ;;  %v2116_v1 = vpop.f32.mrf.mxu1 }
 0x1ec   : > { %2492 = vst [vmem:[%s3726_s5 + $0x7a8] sm:$0xff] %v1544_v62  ;;  %2494 = vst [vmem:[%s3726_s5 + $0x7b8] sm:$0xff] %v2113_v63  ;;  %v1548_v2 = vadd.f32 %v1547_v0, %v736_v61  ;;  %v2117_v3 = vadd.f32 %v2116_v1, %v736_v61 }
 0x1ed   : > { %v1549_v4 = vpop.f32.mrf.mxu0  ;;  %v2118_v5 = vpop.f32.mrf.mxu1 }
 0x1ee   : > { %2495 = vst [vmem:[%s3726_s5 + $0x7c0] sm:$0xff] %v1548_v2  ;;  %2497 = vst [vmem:[%s3726_s5 + $0x7d0] sm:$0xff] %v2117_v3  ;;  %v1550_v7 = vadd.f32 %v1549_v4, %v736_v61  ;;  %v2119_v8 = vadd.f32 %v2118_v5, %v736_v61  ;;  %v776_v5 = vpop.permute.xlu0 %775 }
 0x1ef   : > { %v1553_v9 = vpop.f32.mrf.mxu0  ;;  %v2122_v10 = vpop.f32.mrf.mxu1 }
 0x1f0   : > { %2496 = vst [vmem:[%s3726_s5 + $0x7c8] sm:$0xff] %v1550_v7  ;;  %2498 = vst [vmem:[%s3726_s5 + $0x7d8] sm:$0xff] %v2119_v8  ;;  %v1554_v11 = vadd.f32 %v1553_v9, %v741_v6  ;;  %v2123_v12 = vadd.f32 %v2122_v10, %v741_v6 }
 0x1f1   : > { %v1555_v13 = vpop.f32.mrf.mxu0  ;;  %v2124_v14 = vpop.f32.mrf.mxu1 }
 0x1f2   : > { %2499 = vst [vmem:[%s3726_s5 + $0x7e0] sm:$0xff] %v1554_v11  ;;  %2501 = vst [vmem:[%s3726_s5 + $0x7f0] sm:$0xff] %v2123_v12  ;;  %v1556_v15 = vadd.f32 %v1555_v13, %v741_v6  ;;  %v2125_v17 = vadd.f32 %v2124_v14, %v741_v6  ;;  %v781_v14 = vpop.permute.xlu1 %780 }
 0x1f3   : > { %v1559_v18 = vpop.f32.mrf.mxu0  ;;  %v2128_v19 = vpop.f32.mrf.mxu1 }
 0x1f4   : > { %2500 = vst [vmem:[%s3726_s5 + $0x7e8] sm:$0xff] %v1556_v15  ;;  %2502 = vst [vmem:[%s3726_s5 + $0x7f8] sm:$0xff] %v2125_v17  ;;  %v1560_v20 = vadd.f32 %v1559_v18, %v746_v16  ;;  %v2129_v21 = vadd.f32 %v2128_v19, %v746_v16 }
 0x1f5   : > { %v1561_v22 = vpop.f32.mrf.mxu0  ;;  %v2130_v23 = vpop.f32.mrf.mxu1 }
 0x1f6   : > { %2503 = vst [vmem:[%s3726_s5 + $0x800] sm:$0xff] %v1560_v20  ;;  %2505 = vst [vmem:[%s3726_s5 + $0x810] sm:$0xff] %v2129_v21  ;;  %v1562_v25 = vadd.f32 %v1561_v22, %v746_v16  ;;  %v2131_v26 = vadd.f32 %v2130_v23, %v746_v16  ;;  %v786_v23 = vpop.permute.xlu0 %785 }
 0x1f7   : > { %v1565_v27 = vpop.f32.mrf.mxu0  ;;  %v2134_v28 = vpop.f32.mrf.mxu1 }
 0x1f8   : > { %2504 = vst [vmem:[%s3726_s5 + $0x808] sm:$0xff] %v1562_v25  ;;  %2506 = vst [vmem:[%s3726_s5 + $0x818] sm:$0xff] %v2131_v26  ;;  %v1566_v29 = vadd.f32 %v1565_v27, %v751_v24  ;;  %v2135_v30 = vadd.f32 %v2134_v28, %v751_v24 }
 0x1f9   : > { %v1567_v31 = vpop.f32.mrf.mxu0  ;;  %v2136_v32 = vpop.f32.mrf.mxu1 }
 0x1fa   : > { %2507 = vst [vmem:[%s3726_s5 + $0x820] sm:$0xff] %v1566_v29  ;;  %2509 = vst [vmem:[%s3726_s5 + $0x830] sm:$0xff] %v2135_v30  ;;  %v1568_v34 = vadd.f32 %v1567_v31, %v751_v24  ;;  %v2137_v35 = vadd.f32 %v2136_v32, %v751_v24  ;;  %v791_v32 = vpop.permute.xlu1 %790 }
 0x1fb   : > { %v1571_v36 = vpop.f32.mrf.mxu0  ;;  %v2140_v37 = vpop.f32.mrf.mxu1 }
 0x1fc   : > { %2508 = vst [vmem:[%s3726_s5 + $0x828] sm:$0xff] %v1568_v34  ;;  %2510 = vst [vmem:[%s3726_s5 + $0x838] sm:$0xff] %v2137_v35  ;;  %v1572_v38 = vadd.f32 %v1571_v36, %v756_v33  ;;  %v2141_v39 = vadd.f32 %v2140_v37, %v756_v33 }
 0x1fd   : > { %v1573_v40 = vpop.f32.mrf.mxu0  ;;  %v2142_v41 = vpop.f32.mrf.mxu1 }
 0x1fe   : > { %2511 = vst [vmem:[%s3726_s5 + $0x840] sm:$0xff] %v1572_v38  ;;  %2513 = vst [vmem:[%s3726_s5 + $0x850] sm:$0xff] %v2141_v39  ;;  %v1574_v43 = vadd.f32 %v1573_v40, %v756_v33  ;;  %v2143_v44 = vadd.f32 %v2142_v41, %v756_v33  ;;  %v796_v41 = vpop.permute.xlu0 %795 }
 0x1ff   : > { %v1577_v45 = vpop.f32.mrf.mxu0  ;;  %v2146_v46 = vpop.f32.mrf.mxu1 }
 0x200   : > { %2512 = vst [vmem:[%s3726_s5 + $0x848] sm:$0xff] %v1574_v43  ;;  %2514 = vst [vmem:[%s3726_s5 + $0x858] sm:$0xff] %v2143_v44  ;;  %v1578_v47 = vadd.f32 %v1577_v45, %v761_v42  ;;  %v2147_v48 = vadd.f32 %v2146_v46, %v761_v42 }
 0x201   : > { %v1579_v49 = vpop.f32.mrf.mxu0  ;;  %v2148_v50 = vpop.f32.mrf.mxu1 }
 0x202   : > { %2515 = vst [vmem:[%s3726_s5 + $0x860] sm:$0xff] %v1578_v47  ;;  %2517 = vst [vmem:[%s3726_s5 + $0x870] sm:$0xff] %v2147_v48  ;;  %v1580_v52 = vadd.f32 %v1579_v49, %v761_v42  ;;  %v2149_v53 = vadd.f32 %v2148_v50, %v761_v42  ;;  %v801_v50 = vpop.permute.xlu1 %800 }
 0x203   : > { %v1583_v54 = vpop.f32.mrf.mxu0  ;;  %v2152_v55 = vpop.f32.mrf.mxu1 }
 0x204   : > { %2516 = vst [vmem:[%s3726_s5 + $0x868] sm:$0xff] %v1580_v52  ;;  %2518 = vst [vmem:[%s3726_s5 + $0x878] sm:$0xff] %v2149_v53  ;;  %v1584_v56 = vadd.f32 %v1583_v54, %v766_v51  ;;  %v2153_v57 = vadd.f32 %v2152_v55, %v766_v51 }
 0x205   : > { %v1585_v58 = vpop.f32.mrf.mxu0  ;;  %v2154_v59 = vpop.f32.mrf.mxu1 }
 0x206   : > { %2519 = vst [vmem:[%s3726_s5 + $0x880] sm:$0xff] %v1584_v56  ;;  %2521 = vst [vmem:[%s3726_s5 + $0x890] sm:$0xff] %v2153_v57  ;;  %v1586_v61 = vadd.f32 %v1585_v58, %v766_v51  ;;  %v2155_v62 = vadd.f32 %v2154_v59, %v766_v51  ;;  %v806_v59 = vpop.permute.xlu0 %805 }
 0x207   : > { %v1589_v63 = vpop.f32.mrf.mxu0  ;;  %v2158_v0 = vpop.f32.mrf.mxu1 }
 0x208   : > { %2520 = vst [vmem:[%s3726_s5 + $0x888] sm:$0xff] %v1586_v61  ;;  %2522 = vst [vmem:[%s3726_s5 + $0x898] sm:$0xff] %v2155_v62  ;;  %v1590_v1 = vadd.f32 %v1589_v63, %v771_v60  ;;  %v2159_v2 = vadd.f32 %v2158_v0, %v771_v60 }
 0x209   : > { %v1591_v3 = vpop.f32.mrf.mxu0  ;;  %v2160_v4 = vpop.f32.mrf.mxu1 }
 0x20a   : > { %2523 = vst [vmem:[%s3726_s5 + $0x8a0] sm:$0xff] %v1590_v1  ;;  %2525 = vst [vmem:[%s3726_s5 + $0x8b0] sm:$0xff] %v2159_v2  ;;  %v1592_v6 = vadd.f32 %v1591_v3, %v771_v60  ;;  %v2161_v7 = vadd.f32 %v2160_v4, %v771_v60  ;;  %v811_v4 = vpop.permute.xlu1 %810 }
 0x20b   : > { %v1595_v8 = vpop.f32.mrf.mxu0  ;;  %v2164_v9 = vpop.f32.mrf.mxu1 }
 0x20c   : > { %2524 = vst [vmem:[%s3726_s5 + $0x8a8] sm:$0xff] %v1592_v6  ;;  %2526 = vst [vmem:[%s3726_s5 + $0x8b8] sm:$0xff] %v2161_v7  ;;  %v1596_v10 = vadd.f32 %v1595_v8, %v776_v5  ;;  %v2165_v11 = vadd.f32 %v2164_v9, %v776_v5 }
 0x20d   : > { %v1597_v12 = vpop.f32.mrf.mxu0  ;;  %v2166_v13 = vpop.f32.mrf.mxu1 }
 0x20e   : > { %2527 = vst [vmem:[%s3726_s5 + $0x8c0] sm:$0xff] %v1596_v10  ;;  %2529 = vst [vmem:[%s3726_s5 + $0x8d0] sm:$0xff] %v2165_v11  ;;  %v1598_v16 = vadd.f32 %v1597_v12, %v776_v5  ;;  %v2167_v15 = vadd.f32 %v2166_v13, %v776_v5  ;;  %v816_v13 = vpop.permute.xlu0 %815 }
 0x20f   : > { %v1601_v17 = vpop.f32.mrf.mxu0  ;;  %v2170_v18 = vpop.f32.mrf.mxu1 }
 0x210   : > { %2528 = vst [vmem:[%s3726_s5 + $0x8c8] sm:$0xff] %v1598_v16  ;;  %2530 = vst [vmem:[%s3726_s5 + $0x8d8] sm:$0xff] %v2167_v15  ;;  %v1602_v19 = vadd.f32 %v1601_v17, %v781_v14  ;;  %v2171_v20 = vadd.f32 %v2170_v18, %v781_v14 }
 0x211   : > { %v1603_v21 = vpop.f32.mrf.mxu0  ;;  %v2172_v22 = vpop.f32.mrf.mxu1 }
 0x212   : > { %2531 = vst [vmem:[%s3726_s5 + $0x8e0] sm:$0xff] %v1602_v19  ;;  %2533 = vst [vmem:[%s3726_s5 + $0x8f0] sm:$0xff] %v2171_v20  ;;  %v1604_v24 = vadd.f32 %v1603_v21, %v781_v14  ;;  %v2173_v25 = vadd.f32 %v2172_v22, %v781_v14  ;;  %v821_v22 = vpop.permute.xlu1 %820 }
 0x213   : > { %v1607_v26 = vpop.f32.mrf.mxu0  ;;  %v2176_v27 = vpop.f32.mrf.mxu1 }
 0x214   : > { %2532 = vst [vmem:[%s3726_s5 + $0x8e8] sm:$0xff] %v1604_v24  ;;  %2534 = vst [vmem:[%s3726_s5 + $0x8f8] sm:$0xff] %v2173_v25  ;;  %v1608_v28 = vadd.f32 %v1607_v26, %v786_v23  ;;  %v2177_v29 = vadd.f32 %v2176_v27, %v786_v23 }
 0x215   : > { %v1609_v30 = vpop.f32.mrf.mxu0  ;;  %v2178_v31 = vpop.f32.mrf.mxu1 }
 0x216   : > { %2535 = vst [vmem:[%s3726_s5 + $0x900] sm:$0xff] %v1608_v28  ;;  %2537 = vst [vmem:[%s3726_s5 + $0x910] sm:$0xff] %v2177_v29  ;;  %v1610_v33 = vadd.f32 %v1609_v30, %v786_v23  ;;  %v2179_v34 = vadd.f32 %v2178_v31, %v786_v23  ;;  %v826_v31 = vpop.permute.xlu0 %825 }
 0x217   : > { %v1613_v35 = vpop.f32.mrf.mxu0  ;;  %v2182_v36 = vpop.f32.mrf.mxu1 }
 0x218   : > { %2536 = vst [vmem:[%s3726_s5 + $0x908] sm:$0xff] %v1610_v33  ;;  %2538 = vst [vmem:[%s3726_s5 + $0x918] sm:$0xff] %v2179_v34  ;;  %v1614_v37 = vadd.f32 %v1613_v35, %v791_v32  ;;  %v2183_v38 = vadd.f32 %v2182_v36, %v791_v32 }
 0x219   : > { %v1615_v39 = vpop.f32.mrf.mxu0  ;;  %v2184_v40 = vpop.f32.mrf.mxu1 }
 0x21a   : > { %2539 = vst [vmem:[%s3726_s5 + $0x920] sm:$0xff] %v1614_v37  ;;  %2541 = vst [vmem:[%s3726_s5 + $0x930] sm:$0xff] %v2183_v38  ;;  %v1616_v42 = vadd.f32 %v1615_v39, %v791_v32  ;;  %v2185_v43 = vadd.f32 %v2184_v40, %v791_v32  ;;  %v831_v40 = vpop.permute.xlu1 %830 }
 0x21b   : > { %v1619_v44 = vpop.f32.mrf.mxu0  ;;  %v2188_v45 = vpop.f32.mrf.mxu1 }
 0x21c   : > { %2540 = vst [vmem:[%s3726_s5 + $0x928] sm:$0xff] %v1616_v42  ;;  %2542 = vst [vmem:[%s3726_s5 + $0x938] sm:$0xff] %v2185_v43  ;;  %v1620_v46 = vadd.f32 %v1619_v44, %v796_v41  ;;  %v2189_v47 = vadd.f32 %v2188_v45, %v796_v41 }
 0x21d   : > { %v1621_v48 = vpop.f32.mrf.mxu0  ;;  %v2190_v49 = vpop.f32.mrf.mxu1 }
 0x21e   : > { %2543 = vst [vmem:[%s3726_s5 + $0x940] sm:$0xff] %v1620_v46  ;;  %2545 = vst [vmem:[%s3726_s5 + $0x950] sm:$0xff] %v2189_v47  ;;  %v1622_v51 = vadd.f32 %v1621_v48, %v796_v41  ;;  %v2191_v52 = vadd.f32 %v2190_v49, %v796_v41  ;;  %v836_v49 = vpop.permute.xlu0 %835 }
 0x21f   : > { %v1625_v53 = vpop.f32.mrf.mxu0  ;;  %v2194_v54 = vpop.f32.mrf.mxu1 }
 0x220   : > { %2544 = vst [vmem:[%s3726_s5 + $0x948] sm:$0xff] %v1622_v51  ;;  %2546 = vst [vmem:[%s3726_s5 + $0x958] sm:$0xff] %v2191_v52  ;;  %v1626_v55 = vadd.f32 %v1625_v53, %v801_v50  ;;  %v2195_v56 = vadd.f32 %v2194_v54, %v801_v50 }
 0x221   : > { %v1627_v57 = vpop.f32.mrf.mxu0  ;;  %v2196_v58 = vpop.f32.mrf.mxu1 }
 0x222   : > { %2547 = vst [vmem:[%s3726_s5 + $0x960] sm:$0xff] %v1626_v55  ;;  %2549 = vst [vmem:[%s3726_s5 + $0x970] sm:$0xff] %v2195_v56  ;;  %v1628_v60 = vadd.f32 %v1627_v57, %v801_v50  ;;  %v2197_v61 = vadd.f32 %v2196_v58, %v801_v50  ;;  %v841_v58 = vpop.permute.xlu1 %840 }
 0x223   : > { %v1631_v62 = vpop.f32.mrf.mxu0  ;;  %v2200_v63 = vpop.f32.mrf.mxu1 }
 0x224   : > { %2548 = vst [vmem:[%s3726_s5 + $0x968] sm:$0xff] %v1628_v60  ;;  %2550 = vst [vmem:[%s3726_s5 + $0x978] sm:$0xff] %v2197_v61  ;;  %v1632_v0 = vadd.f32 %v1631_v62, %v806_v59  ;;  %v2201_v1 = vadd.f32 %v2200_v63, %v806_v59 }
 0x225   : > { %v1633_v2 = vpop.f32.mrf.mxu0  ;;  %v2202_v3 = vpop.f32.mrf.mxu1 }
 0x226   : > { %2551 = vst [vmem:[%s3726_s5 + $0x980] sm:$0xff] %v1632_v0  ;;  %2553 = vst [vmem:[%s3726_s5 + $0x990] sm:$0xff] %v2201_v1  ;;  %v1634_v5 = vadd.f32 %v1633_v2, %v806_v59  ;;  %v2203_v6 = vadd.f32 %v2202_v3, %v806_v59 }
 0x227   : > { %v1637_v7 = vpop.f32.mrf.mxu0  ;;  %v2206_v8 = vpop.f32.mrf.mxu1 }
 0x228   : > { %2552 = vst [vmem:[%s3726_s5 + $0x988] sm:$0xff] %v1634_v5  ;;  %2554 = vst [vmem:[%s3726_s5 + $0x998] sm:$0xff] %v2203_v6  ;;  %v1638_v9 = vadd.f32 %v1637_v7, %v811_v4  ;;  %v2207_v10 = vadd.f32 %v2206_v8, %v811_v4 }
 0x229   : > { %v1639_v11 = vpop.f32.mrf.mxu0  ;;  %v2208_v12 = vpop.f32.mrf.mxu1 }
 0x22a   : > { %2555 = vst [vmem:[%s3726_s5 + $0x9a0] sm:$0xff] %v1638_v9  ;;  %2557 = vst [vmem:[%s3726_s5 + $0x9b0] sm:$0xff] %v2207_v10  ;;  %v1640_v14 = vadd.f32 %v1639_v11, %v811_v4  ;;  %v2209_v16 = vadd.f32 %v2208_v12, %v811_v4 }
 0x22b   : > { %v1643_v15 = vpop.f32.mrf.mxu0  ;;  %v2212_v17 = vpop.f32.mrf.mxu1 }
 0x22c   : > { %2556 = vst [vmem:[%s3726_s5 + $0x9a8] sm:$0xff] %v1640_v14  ;;  %2558 = vst [vmem:[%s3726_s5 + $0x9b8] sm:$0xff] %v2209_v16  ;;  %v1644_v18 = vadd.f32 %v1643_v15, %v816_v13  ;;  %v2213_v19 = vadd.f32 %v2212_v17, %v816_v13 }
 0x22d   : > { %v1645_v20 = vpop.f32.mrf.mxu0  ;;  %v2214_v21 = vpop.f32.mrf.mxu1 }
 0x22e   : > { %2559 = vst [vmem:[%s3726_s5 + $0x9c0] sm:$0xff] %v1644_v18  ;;  %2561 = vst [vmem:[%s3726_s5 + $0x9d0] sm:$0xff] %v2213_v19  ;;  %v1646_v23 = vadd.f32 %v1645_v20, %v816_v13  ;;  %v2215_v24 = vadd.f32 %v2214_v21, %v816_v13 }
 0x22f   : > { %v1649_v25 = vpop.f32.mrf.mxu0  ;;  %v2218_v26 = vpop.f32.mrf.mxu1 }
 0x230   : > { %2560 = vst [vmem:[%s3726_s5 + $0x9c8] sm:$0xff] %v1646_v23  ;;  %2562 = vst [vmem:[%s3726_s5 + $0x9d8] sm:$0xff] %v2215_v24  ;;  %v1650_v27 = vadd.f32 %v1649_v25, %v821_v22  ;;  %v2219_v28 = vadd.f32 %v2218_v26, %v821_v22 }
 0x231   : > { %v1651_v29 = vpop.f32.mrf.mxu0  ;;  %v2220_v30 = vpop.f32.mrf.mxu1 }
 0x232   : > { %2563 = vst [vmem:[%s3726_s5 + $0x9e0] sm:$0xff] %v1650_v27  ;;  %2565 = vst [vmem:[%s3726_s5 + $0x9f0] sm:$0xff] %v2219_v28  ;;  %v1652_v32 = vadd.f32 %v1651_v29, %v821_v22  ;;  %v2221_v33 = vadd.f32 %v2220_v30, %v821_v22 }
 0x233   : > { %v1655_v34 = vpop.f32.mrf.mxu0  ;;  %v2224_v35 = vpop.f32.mrf.mxu1 }
 0x234   : > { %2564 = vst [vmem:[%s3726_s5 + $0x9e8] sm:$0xff] %v1652_v32  ;;  %2566 = vst [vmem:[%s3726_s5 + $0x9f8] sm:$0xff] %v2221_v33  ;;  %v1656_v36 = vadd.f32 %v1655_v34, %v826_v31  ;;  %v2225_v37 = vadd.f32 %v2224_v35, %v826_v31 }
 0x235   : > { %v1657_v38 = vpop.f32.mrf.mxu0  ;;  %v2226_v39 = vpop.f32.mrf.mxu1 }
 0x236   : > { %2567 = vst [vmem:[%s3726_s5 + $0xa00] sm:$0xff] %v1656_v36  ;;  %2569 = vst [vmem:[%s3726_s5 + $0xa10] sm:$0xff] %v2225_v37  ;;  %v1658_v41 = vadd.f32 %v1657_v38, %v826_v31  ;;  %v2227_v42 = vadd.f32 %v2226_v39, %v826_v31 }
 0x237   : > { %v1661_v43 = vpop.f32.mrf.mxu0  ;;  %v2230_v44 = vpop.f32.mrf.mxu1 }
 0x238   : > { %2568 = vst [vmem:[%s3726_s5 + $0xa08] sm:$0xff] %v1658_v41  ;;  %2570 = vst [vmem:[%s3726_s5 + $0xa18] sm:$0xff] %v2227_v42  ;;  %v1662_v45 = vadd.f32 %v1661_v43, %v831_v40  ;;  %v2231_v46 = vadd.f32 %v2230_v44, %v831_v40 }
 0x239   : > { %v1663_v47 = vpop.f32.mrf.mxu0  ;;  %v2232_v48 = vpop.f32.mrf.mxu1 }
 0x23a   : > { %2571 = vst [vmem:[%s3726_s5 + $0xa20] sm:$0xff] %v1662_v45  ;;  %2573 = vst [vmem:[%s3726_s5 + $0xa30] sm:$0xff] %v2231_v46  ;;  %v1664_v50 = vadd.f32 %v1663_v47, %v831_v40  ;;  %v2233_v51 = vadd.f32 %v2232_v48, %v831_v40 }
 0x23b   : > { %v1667_v52 = vpop.f32.mrf.mxu0  ;;  %v2236_v53 = vpop.f32.mrf.mxu1 }
 0x23c   : > { %2572 = vst [vmem:[%s3726_s5 + $0xa28] sm:$0xff] %v1664_v50  ;;  %2574 = vst [vmem:[%s3726_s5 + $0xa38] sm:$0xff] %v2233_v51  ;;  %v1668_v54 = vadd.f32 %v1667_v52, %v836_v49  ;;  %v2237_v55 = vadd.f32 %v2236_v53, %v836_v49 }
 0x23d   : > { %v1669_v56 = vpop.f32.mrf.mxu0  ;;  %v2238_v57 = vpop.f32.mrf.mxu1 }
 0x23e   : > { %2575 = vst [vmem:[%s3726_s5 + $0xa40] sm:$0xff] %v1668_v54  ;;  %2577 = vst [vmem:[%s3726_s5 + $0xa50] sm:$0xff] %v2237_v55  ;;  %v1670_v59 = vadd.f32 %v1669_v56, %v836_v49  ;;  %v2239_v60 = vadd.f32 %v2238_v57, %v836_v49 }
 0x23f   : > { %v1673_v61 = vpop.f32.mrf.mxu0  ;;  %v2242_v62 = vpop.f32.mrf.mxu1 }
 0x240   : > { %2576 = vst [vmem:[%s3726_s5 + $0xa48] sm:$0xff] %v1670_v59  ;;  %2578 = vst [vmem:[%s3726_s5 + $0xa58] sm:$0xff] %v2239_v60  ;;  %v1674_v63 = vadd.f32 %v1673_v61, %v841_v58  ;;  %v2243_v0 = vadd.f32 %v2242_v62, %v841_v58 }
 0x241   : > { %v1675_v1 = vpop.f32.mrf.mxu0  ;;  %v2244_v2 = vpop.f32.mrf.mxu1 }
 0x242   : > { %2579 = vst [vmem:[%s3726_s5 + $0xa60] sm:$0xff] %v1674_v63  ;;  %2581 = vst [vmem:[%s3726_s5 + $0xa70] sm:$0xff] %v2243_v0  ;;  %v1676_v3 = vadd.f32 %v1675_v1, %v841_v58  ;;  %v2245_v4 = vadd.f32 %v2244_v2, %v841_v58 }
 0x244   : > { %2580 = vst [vmem:[%s3726_s5 + $0xa68] sm:$0xff] %v1676_v3  ;;  %2582 = vst [vmem:[%s3726_s5 + $0xa78] sm:$0xff] %v2245_v4 }
 0x245   : > { %2944 = shalt.err (!%p2941_p7)
}
 0x246   : > { %s2945_s5 = scalar_lea.hbm %s4305_s28, 43008  ;;  %s2949_s11 = scalar_lea.hbm %s4362_s3, 86016 }
 0x247   : > { %p2946_p8 = scmp.ne.s32.totalorder %s4305_s28, %s2945_s5  ;;  %p2950_p13 = scmp.lt.s32.totalorder %s4305_s28, %s4362_s3 }
 0x248   : > { %p2951_p0 = scmp.lt.s32.totalorder %s2949_s11, %s2945_s5 }
 0x249   : > { %p2947_p11 = pnand %p2946_p8, %p3074_p5 }
 0x24a   : > { %p2952_p1 = por %p2951_p0, %p2950_p13 }
 0x24b   : > { %p2948_p12 = pneg %p2947_p11 }
 0x24d   : > { %p2953_p2 = pnand %p2952_p1, %p2948_p12 }
 0x24f   : > { %2956 = shalt.err (!%p2953_p2)
}
 0x250   : > { %s3012_s21 = smov 512   ;;  %s3013_s23 = smov 1024  }
 0x251   : > { %s3014_s27 = smov 32  }
 0x252   : > { %2869 = dma.vmem_to_hbm [thread:$0]  (%p3074_p5), %s4307_s26, 43008, %s4305_s28, %s2584_s29, %s3012_s21, %s3013_s23, %s3014_s27  }
 0x253 PF: > { %s2614_s15 = sand.u32 1, %s2987_s12   ;;  %p2872_p3 = pnand %p2684_p10, %p3085_p9 }
 0x254   : > { %s2615_s30 = scalar_lea.sflag [#allocation4], %s2614_s15 }
 0x255   : > { %p2873_p4 = pneg %p2872_p3 }
 0x257   : > { %2982 = dma.done.wait (%p2873_p4), %s2615_s30, 43008  }
 0x258   : > { %2984 = vsyncadd (%p2873_p4), %s2615_s30, 4294924288  ;;  %s16_s17 = sadd.s32 1, %s3007_s17   ;;  %s4365_s12 = smov %s2991_s13 }
 0x259   : > { %p13_p6 = scmp.ge.s32.totalorder %s16_s17, 4   ;;  %s4366_s13 = smov %s2995_s14 }
 0x25a   : > { %s4367_s14 = smov %s3083_s24  ;;  %s4368_s15 = smov %s3003_s16 }
 0x25b   : > { %s4369_s16 = smov %s4371_s20  ;;  %15 = sbr.rel (!%p13_p6) target bundleno = 4 (0x4), region = 95 }
 0x260   :  { %2620 = vsyncpa [#allocation4], 1 }
 0x261   :  { %2622 = vsyncpa [#allocation4 + $0x1], 1 }

</bundles_post_ra>
